<compile_context>
chip_gen: v6e
topology: v6e:2x2x1
jax: 0.10.0
libtpu: 0.0.40
codegen_flags: <defaults>
</compile_context>

<pallas_src>
import functools
import math

import jax
import jax.numpy as jnp
from jax import lax
from jax.experimental import pallas as pl
from jax.experimental.pallas import tpu as pltpu


# ----------------------------- Pallas kernels ------------------------------ #

def _conv_fused_kernel(p1_ref, w1_ref, b1_ref, w2_ref, b2_ref, o_ref, *, n_pos):
    """Fused conv1(5x5,s5)+ReLU+conv2(5x5,s5)+ReLU (stride == kernel).

    p1_ref: (n_pos, TM, K1) bf16   leading axis = conv1-pixel position within
                                   the conv2 patch, TM rows = conv2 output
                                   pixels, K1 = hist*25 patch features.
    w1_ref: (K1, 32) bf16 (1/255 folded in), b1_ref: (1, 32) f32
    w2_ref: (n_pos, 32, 64) bf16,  b2_ref: (1, 64) f32
    o_ref : (TM, 64) bf16 post-ReLU conv2 output (NHWC row layout).
    """
    tm = o_ref.shape[0]
    k1 = p1_ref.shape[2]
    # conv1 as ONE matmul over all positions.  TM % 8 == 0 (wrapper pads), so
    # merging the leading dim into the sublane dim is a pure tile relabel.
    x = p1_ref[...].reshape(n_pos * tm, k1)
    h1 = jnp.dot(x, w1_ref[...], preferred_element_type=jnp.float32)
    h1 = jnp.maximum(h1 + b1_ref[...], 0.0).astype(jnp.bfloat16)   # (n_pos*TM, 32)
    # conv2 = sum over positions of (TM,32)x(32,64) partials; slices are static
    # and sublane-aligned (multiples of TM).
    acc = jnp.zeros(o_ref.shape, jnp.float32)
    for p in range(n_pos):
        acc = acc + jnp.dot(h1[p * tm:(p + 1) * tm, :], w2_ref[p],
                            preferred_element_type=jnp.float32)
    o_ref[...] = jnp.maximum(acc + b2_ref[...], 0.0).astype(o_ref.dtype)


def _dueling_head_kernel(feat_ref, wh_ref, bh_ref, wq_ref, bq_ref, o_ref, *,
                         atoms, actions, log):
    """[fc_h_v|fc_h_a] -> ReLU -> dueling-folded fc_z -> (log-)softmax.

    The dueling combine is folded into wq/bq at parameter-prep time, so the
    kernel is just: feat @ Wh + bh, ReLU, @ Wq + bq, softmax over atoms.
    """
    feat = feat_ref[...]                                            # (TB, conv_out) bf16
    hva = jnp.dot(feat, wh_ref[...], preferred_element_type=jnp.float32)
    hva = jnp.maximum(hva + bh_ref[...], 0.0).astype(jnp.bfloat16)  # (TB, 2*hidden)
    q = jnp.dot(hva, wq_ref[...], preferred_element_type=jnp.float32) + bq_ref[...]

    for i in range(actions):                                        # static unroll
        sl = slice(i * atoms, (i + 1) * atoms)
        qi = q[:, sl]
        m = jnp.max(qi, axis=-1, keepdims=True)
        e = jnp.exp(qi - m)
        s = jnp.sum(e, axis=-1, keepdims=True)
        if log:
            o_ref[:, sl] = (qi - m) - jnp.log(s)
        else:
            o_ref[:, sl] = e / s          # exact divide: rows sum to 1


# --------------------------- parameter construction ------------------------ #

def _scale_noise(x):
    return jnp.sign(x) * jnp.sqrt(jnp.abs(x))


def _make_noisy_raw(key, in_features, out_features, std_init=0.5):
    """Training-mode effective NoisyLinear params, PyTorch layout W:(out,in), b:(out,)."""
    k1, k2, k3, k4 = jax.random.split(key, 4)
    mu_range = 1.0 / math.sqrt(in_features)
    weight_mu = jax.random.uniform(k1, (out_features, in_features),
                                   minval=-mu_range, maxval=mu_range)
    weight_sigma = jnp.full((out_features, in_features),
                            std_init / math.sqrt(in_features))
    bias_mu = jax.random.uniform(k2, (out_features,),
                                 minval=-mu_range, maxval=mu_range)
    bias_sigma = jnp.full((out_features,), std_init / math.sqrt(out_features))
    eps_in = _scale_noise(jax.random.normal(k3, (in_features,)))
    eps_out = _scale_noise(jax.random.normal(k4, (out_features,)))
    W = weight_mu + weight_sigma * jnp.outer(eps_out, eps_in)
    b = bias_mu + bias_sigma * eps_out
    return W.astype(jnp.float32), b.astype(jnp.float32)


def _make_conv_raw(key, in_c, out_c, k):
    """PyTorch Conv2d init: W (out_c, in_c, k, k), b (out_c,)."""
    k1, k2 = jax.random.split(key)
    fan_in = in_c * k * k
    bound = 1.0 / math.sqrt(fan_in)
    w = jax.random.uniform(k1, (out_c, in_c, k, k), minval=-bound, maxval=bound)
    b = jax.random.uniform(k2, (out_c,), minval=-bound, maxval=bound)
    return w.astype(jnp.float32), b.astype(jnp.float32)


def make_dqn_params(key, *, history_length, pixel_shape, hidden_size, atoms,
                    action_space, noisy_std=0.5):
    """Returns (kernel_params, raw_params).  kernel_params are pre-packed:
    bf16 weights, (1,N) f32 biases, /255 folded into conv1, conv2 in
    (pos, in, out) layout, fc_h permuted to the conv kernel's NHWC feature
    order and concatenated [v|a], and the dueling combine folded into a single
    (2*hidden, A*atoms) weight Wq / bias bq (exact)."""
    keys = jax.random.split(key, 6)
    H, W = pixel_shape
    oh1, ow1 = H // 5, W // 5
    oh2, ow2 = oh1 // 5, ow1 // 5
    assert oh2 >= 1 and ow2 >= 1, "pixel_shape too small for two stride-5 convs"
    conv_out = oh2 * ow2 * 64

    w1, b1 = _make_conv_raw(keys[0], history_length, 32, 5)
    w2, b2 = _make_conv_raw(keys[1], 32, 64, 5)
    whv, bhv = _make_noisy_raw(keys[2], conv_out, hidden_size, noisy_std)
    wha, bha = _make_noisy_raw(keys[3], conv_out, hidden_size, noisy_std)
    wzv, bzv = _make_noisy_raw(keys[4], hidden_size, atoms, noisy_std)
    wza, bza = _make_noisy_raw(keys[5], hidden_size, action_space * atoms, noisy_std)

    raw = {
        "conv1_w": w1, "conv1_b": b1, "conv2_w": w2, "conv2_b": b2,
        "fc_h_v": (whv, bhv), "fc_h_a": (wha, bha),
        "fc_z_v": (wzv, bzv), "fc_z_a": (wza, bza),
    }

    K1 = history_length * 25

    def perm_fc_h(w):
        # PyTorch feat order is NCHW-flatten (c, r2, c2); the conv kernel emits
        # NHWC-flatten (r2, c2, c).  Permute weight columns accordingly.
        w4 = w.reshape(hidden_size, 64, oh2, ow2)
        return jnp.transpose(w4, (0, 2, 3, 1)).reshape(hidden_size, conv_out).T

    # Fold the dueling combine into the fc_z weights (exact):
    #   q_{i,j} = hv @ wzv[j] + bzv[j]
    #           + ha @ (wza_{i,j} - mean_i wza_{:,j}) + (bza_{i,j} - mean_i bza_{:,j})
    wza3 = wza.reshape(action_space, atoms, hidden_size)
    wza_c = wza3 - jnp.mean(wza3, axis=0, keepdims=True)            # (A, atoms, hidden)
    wq_top = jnp.tile(wzv.T, (1, action_space))                     # (hidden, A*atoms)
    wq_bot = jnp.transpose(wza_c, (2, 0, 1)).reshape(hidden_size, action_space * atoms)
    wq = jnp.concatenate([wq_top, wq_bot], axis=0)                  # (2*hidden, A*atoms)
    bza2 = bza.reshape(action_space, atoms)
    bq = (bzv[None, :] + bza2 - jnp.mean(bza2, axis=0, keepdims=True)
          ).reshape(1, action_space * atoms)

    params = {
        # conv1: (K1, 32), 1/255 folded in.
        "conv1_w": (w1.reshape(32, K1) / 255.0).T.astype(jnp.bfloat16),
        "conv1_b": b1.reshape(1, 32).astype(jnp.float32),
        # conv2: (25, 32, 64) = (kernel position, in_ch, out_ch).
        "conv2_w": jnp.transpose(w2, (2, 3, 1, 0)).reshape(25, 32, 64).astype(jnp.bfloat16),
        "conv2_b": b2.reshape(1, 64).astype(jnp.float32),
        # heads: fc_h_v | fc_h_a concatenated -> (conv_out, 2*hidden).
        "fc_h_w": jnp.concatenate([perm_fc_h(whv), perm_fc_h(wha)], axis=1).astype(jnp.bfloat16),
        "fc_h_b": jnp.concatenate([bhv, bha]).reshape(1, 2 * hidden_size).astype(jnp.float32),
        # dueling-folded fc_z.
        "fc_zq_w": wq.astype(jnp.bfloat16),
        "fc_zq_b": bq.astype(jnp.float32),
    }
    return params, raw


# --------------------------------- forward --------------------------------- #

def _pick_tile(m, cap=256):
    """Row tile for the conv grid.  m is a multiple of 8.  Picks the largest
    multiple of 8 dividing m, capped, and forces >= 2 grid steps when m >= 16
    so v7x's two TensorCores both get work."""
    assert m % 8 == 0
    limit = m if m < 16 else m // 2
    limit = max(8, min(cap, (limit // 8) * 8))
    t = limit
    while m % t:
        t -= 8
    return t


def _pick_batch_tile(b, cap=128):
    """Batch-row tile for the dueling head (full block when b is not 8-aligned)."""
    if b % 8 != 0:
        return b
    limit = b if b < 16 else b // 2
    limit = max(8, min(cap, (limit // 8) * 8))
    t = limit
    while b % t:
        t -= 8
    return t


def dqn_forward(x, params, *, history_length, pixel_shape, ram_len,
                action_space, atoms, hidden_size, log=False):
    """x: (B, history_length, ram_len + H*W) f32.  Matches DQN.forward for the
    'data-efficient' architecture (ram_state split off but unused)."""
    B = x.shape[0]
    H, W = pixel_shape
    _ram_state = x[:, :, :ram_len]                       # unused (data-efficient)
    pixel = x[:, :, ram_len:].reshape(B, history_length, H, W)

    oh1, ow1 = H // 5, W // 5
    oh2, ow2 = oh1 // 5, ow1 // 5
    conv_out = oh2 * ow2 * 64
    K1 = history_length * 25

    # Crop to the region the two valid stride-5 convs read, then pack into
    # position-major patches (25, M2, K1): leading = (dr, dc) conv1 position
    # within the conv2 patch, row = conv2 output pixel (b, r2, c2),
    # last = (C, kh, kw) conv1 patch features.
    pixel = pixel[:, :, :oh2 * 25, :ow2 * 25]
    p = pixel.reshape(B, history_length, oh2, 5, 5, ow2, 5, 5)
    # (b, c, r2, dr, kh, c2, dc, kw) -> (dr, dc, b, r2, c2, c, kh, kw)
    p = jnp.transpose(p, (3, 6, 0, 2, 5, 1, 4, 7))
    M2 = B * oh2 * ow2
    p1 = p.reshape(25, M2, K1).astype(jnp.bfloat16)      # /255 folded into conv1_w

    # Pad rows to a multiple of 8 so every row tile is sublane-aligned and the
    # in-kernel leading-dim merge is a free tile relabel.
    M2p = ((M2 + 7) // 8) * 8
    if M2p != M2:
        p1 = jnp.pad(p1, ((0, 0), (0, M2p - M2), (0, 0)))

    TM2 = _pick_tile(M2p)

    h2 = pl.pallas_call(
        functools.partial(_conv_fused_kernel, n_pos=25),
        out_shape=jax.ShapeDtypeStruct((M2p, 64), jnp.bfloat16),
        grid=(M2p // TM2,),
        in_specs=[
            pl.BlockSpec((25, TM2, K1), lambda i: (0, i, 0)),
            pl.BlockSpec((K1, 32), lambda i: (0, 0)),
            pl.BlockSpec((1, 32), lambda i: (0, 0)),
            pl.BlockSpec((25, 32, 64), lambda i: (0, 0, 0)),
            pl.BlockSpec((1, 64), lambda i: (0, 0)),
        ],
        out_specs=pl.BlockSpec((TM2, 64), lambda i: (i, 0)),
        compiler_params=pltpu.CompilerParams(
            dimension_semantics=("parallel",),
            vmem_limit_bytes=32 * 1024 * 1024),
    )(p1, params["conv1_w"], params["conv1_b"],
      params["conv2_w"], params["conv2_b"])

    # NHWC flatten; head weights are permuted to match, so this is layout-free.
    feat = h2[:M2].reshape(B, conv_out)

    TB = _pick_batch_tile(B)
    q2d = pl.pallas_call(
        functools.partial(_dueling_head_kernel, atoms=atoms,
                          actions=action_space, log=log),
        out_shape=jax.ShapeDtypeStruct((B, action_space * atoms), jnp.float32),
        grid=(B // TB,),
        in_specs=[
            pl.BlockSpec((TB, conv_out), lambda i: (i, 0)),
            pl.BlockSpec((conv_out, 2 * hidden_size), lambda i: (0, 0)),
            pl.BlockSpec((1, 2 * hidden_size), lambda i: (0, 0)),
            pl.BlockSpec((2 * hidden_size, action_space * atoms), lambda i: (0, 0)),
            pl.BlockSpec((1, action_space * atoms), lambda i: (0, 0)),
        ],
        out_specs=pl.BlockSpec((TB, action_space * atoms), lambda i: (i, 0)),
        compiler_params=pltpu.CompilerParams(
            dimension_semantics=("parallel",)),
    )(feat, params["fc_h_w"], params["fc_h_b"],
      params["fc_zq_w"], params["fc_zq_b"])

    return q2d.reshape(B, action_space, atoms)


# ------------------------------ pure-JAX reference -------------------------- #

def _reference_forward(x, raw, *, history_length, pixel_shape, ram_len,
                       action_space, atoms, log=False):
    B = x.shape[0]
    H, W = pixel_shape
    pixel = x[:, :, ram_len:].reshape(B, history_length, H, W) / 255.0

    def conv(z, w, b):
        y = lax.conv_general_dilated(z, w, (5, 5), "VALID",
                                     dimension_numbers=("NCHW", "OIHW", "NCHW"))
        return jnp.maximum(y + b.reshape(1, -1, 1, 1), 0.0)

    h = conv(pixel, raw["conv1_w"], raw["conv1_b"])
    h = conv(h, raw["conv2_w"], raw["conv2_b"])
    feat = h.reshape(B, -1)

    def lin(z, wb):
        w, b = wb
        return z @ w.T + b

    hv = jnp.maximum(lin(feat, raw["fc_h_v"]), 0.0)
    v = lin(hv, raw["fc_z_v"])
    ha = jnp.maximum(lin(feat, raw["fc_h_a"]), 0.0)
    a = lin(ha, raw["fc_z_a"])
    v = v.reshape(B, 1, atoms)
    a = a.reshape(B, action_space, atoms)
    q = v + a - a.mean(1, keepdims=True)
    if log:
        return jax.nn.log_softmax(q, axis=2)
    return jax.nn.softmax(q, axis=2)


# ----------------------------------- main ----------------------------------- #

if __name__ == "__main__":
    B = 2
    HISTORY = 4
    PIXEL_SHAPE = (25, 25)       # spatial must cover two stride-5 convs
    RAM_LEN = 8
    HIDDEN = 32
    ATOMS = 8
    ACTIONS = 4

    key = jax.random.PRNGKey(0)
    kp, kx = jax.random.split(key)
    params, raw = make_dqn_params(kp, history_length=HISTORY,
                                  pixel_shape=PIXEL_SHAPE, hidden_size=HIDDEN,
                                  atoms=ATOMS, action_space=ACTIONS,
                                  noisy_std=0.5)

    x = jax.random.uniform(
        kx, (B, HISTORY, RAM_LEN + PIXEL_SHAPE[0] * PIXEL_SHAPE[1]),
        minval=0.0, maxval=255.0, dtype=jnp.float32)

    fwd = jax.jit(functools.partial(
        dqn_forward, history_length=HISTORY, pixel_shape=PIXEL_SHAPE,
        ram_len=RAM_LEN, action_space=ACTIONS, atoms=ATOMS,
        hidden_size=HIDDEN, log=False))

    q = jax.block_until_ready(fwd(x, params))

    assert q.shape == (B, ACTIONS, ATOMS)
    # exact softmax divide -> rows sum to 1 to float precision
    assert bool(jnp.allclose(jnp.sum(q, axis=-1), 1.0, atol=2e-3))

    # cross-check against a straightforward f32 JAX reference of the module
    q_ref = _reference_forward(x, raw, history_length=HISTORY,
                               pixel_shape=PIXEL_SHAPE, ram_len=RAM_LEN,
                               action_space=ACTIONS, atoms=ATOMS, log=False)
    assert bool(jnp.allclose(q, q_ref, atol=2.5e-2))

    print("KERNEL_OK")
</pallas_src>

<mosaic_0001>
module attributes {stable_mosaic.version = 11 : i64} {
  func.func @_dueling_head_kernel(%arg0: i32, %arg1: memref<2x64xbf16, #tpu.memory_space<vmem>>, %arg2: memref<64x64xbf16, #tpu.memory_space<vmem>>, %arg3: memref<1x64xf32, #tpu.memory_space<vmem>>, %arg4: memref<64x32xbf16, #tpu.memory_space<vmem>>, %arg5: memref<1x32xf32, #tpu.memory_space<vmem>>, %arg6: memref<2x32xf32, #tpu.memory_space<vmem>>) attributes {dimension_semantics = [#tpu.dimension_semantics<parallel>], iteration_bounds = array<i64: 1>, scalar_prefetch = 0 : i64, scratch_operands = 0 : i64, tpu.core_type = #tpu.core_type<tc>, window_params = [{transform_indices = @transform_0, window_bounds = array<i64: 2, 64>}, {pipeline_mode = #tpu.pipeline_mode<synchronous>, transform_indices = @transform_1, window_bounds = array<i64: 64, 64>}, {pipeline_mode = #tpu.pipeline_mode<synchronous>, transform_indices = @transform_2, window_bounds = array<i64: 1, 64>}, {pipeline_mode = #tpu.pipeline_mode<synchronous>, transform_indices = @transform_3, window_bounds = array<i64: 64, 32>}, {pipeline_mode = #tpu.pipeline_mode<synchronous>, transform_indices = @transform_4, window_bounds = array<i64: 1, 32>}, {transform_indices = @transform_5, window_bounds = array<i64: 2, 32>}]} {
    %c0 = arith.constant 0 : index
    %c0_0 = arith.constant 0 : index
    %0 = vector.load %arg1[%c0, %c0_0] : memref<2x64xbf16, #tpu.memory_space<vmem>>, vector<2x64xbf16>
    %c0_1 = arith.constant 0 : index
    %c0_2 = arith.constant 0 : index
    %1 = vector.load %arg2[%c0_1, %c0_2] : memref<64x64xbf16, #tpu.memory_space<vmem>>, vector<64x64xbf16>
    %cst = arith.constant dense<0.000000e+00> : vector<2x64xf32>
    %2 = tpu.matmul %0, %1, %cst {dimension_numbers = #tpu.dot_dimension_numbers<[1], [0], [0], [1], [0, 0, 1, 1], [], []>} : vector<2x64xbf16>, vector<64x64xbf16>, vector<2x64xf32> -> vector<2x64xf32>
    %c0_3 = arith.constant 0 : index
    %c0_4 = arith.constant 0 : index
    %3 = vector.load %arg3[%c0_3, %c0_4] : memref<1x64xf32, #tpu.memory_space<vmem>>, vector<1x64xf32>
    %4 = vector.broadcast %3 : vector<1x64xf32> to vector<2x64xf32>
    %5 = arith.addf %2, %4 : vector<2x64xf32>
    %cst_5 = arith.constant 0.000000e+00 : f32
    %6 = vector.broadcast %cst_5 : f32 to vector<2x64xf32>
    %7 = arith.maximumf %5, %6 : vector<2x64xf32>
    %8 = arith.truncf %7 : vector<2x64xf32> to vector<2x64xbf16>
    %c0_6 = arith.constant 0 : index
    %c0_7 = arith.constant 0 : index
    %9 = vector.load %arg4[%c0_6, %c0_7] : memref<64x32xbf16, #tpu.memory_space<vmem>>, vector<64x32xbf16>
    %cst_8 = arith.constant dense<0.000000e+00> : vector<2x32xf32>
    %10 = tpu.matmul %8, %9, %cst_8 {dimension_numbers = #tpu.dot_dimension_numbers<[1], [0], [0], [1], [0, 0, 1, 1], [], []>} : vector<2x64xbf16>, vector<64x32xbf16>, vector<2x32xf32> -> vector<2x32xf32>
    %c0_9 = arith.constant 0 : index
    %c0_10 = arith.constant 0 : index
    %11 = vector.load %arg5[%c0_9, %c0_10] : memref<1x32xf32, #tpu.memory_space<vmem>>, vector<1x32xf32>
    %12 = vector.broadcast %11 : vector<1x32xf32> to vector<2x32xf32>
    %13 = arith.addf %10, %12 : vector<2x32xf32>
    %14 = vector.extract_strided_slice %13 {offsets = [0, 0], sizes = [2, 8], strides = [1, 1]} : vector<2x32xf32> to vector<2x8xf32>
    %cst_11 = arith.constant dense<0xFF800000> : vector<2xf32>
    %15 = vector.multi_reduction <maximumf>, %14, %cst_11 [1] : vector<2x8xf32> to vector<2xf32>
    %16 = vector.shape_cast %15 : vector<2xf32> to vector<2x1xf32>
    %17 = vector.broadcast %16 : vector<2x1xf32> to vector<2x8xf32>
    %18 = arith.subf %14, %17 : vector<2x8xf32>
    %19 = math.exp %18 : vector<2x8xf32>
    %cst_12 = arith.constant dense<0.000000e+00> : vector<2xf32>
    %20 = vector.multi_reduction <add>, %19, %cst_12 [1] : vector<2x8xf32> to vector<2xf32>
    %21 = vector.shape_cast %20 : vector<2xf32> to vector<2x1xf32>
    %22 = vector.broadcast %21 : vector<2x1xf32> to vector<2x8xf32>
    %23 = arith.divf %19, %22 : vector<2x8xf32>
    %c0_13 = arith.constant 0 : index
    %c0_14 = arith.constant 0 : index
    %24 = vector.load %arg6[%c0_13, %c0_14] : memref<2x32xf32, #tpu.memory_space<vmem>>, vector<2x8xf32>
    tpu.vector_store %arg6[%c0_13, %c0_14], %23 {strides = array<i32>} : memref<2x32xf32, #tpu.memory_space<vmem>>, vector<2x8xf32>,
    %25 = vector.extract_strided_slice %13 {offsets = [0, 8], sizes = [2, 8], strides = [1, 1]} : vector<2x32xf32> to vector<2x8xf32>
    %cst_15 = arith.constant dense<0xFF800000> : vector<2xf32>
    %26 = vector.multi_reduction <maximumf>, %25, %cst_15 [1] : vector<2x8xf32> to vector<2xf32>
    %27 = vector.shape_cast %26 : vector<2xf32> to vector<2x1xf32>
    %28 = vector.broadcast %27 : vector<2x1xf32> to vector<2x8xf32>
    %29 = arith.subf %25, %28 : vector<2x8xf32>
    %30 = math.exp %29 : vector<2x8xf32>
    %cst_16 = arith.constant dense<0.000000e+00> : vector<2xf32>
    %31 = vector.multi_reduction <add>, %30, %cst_16 [1] : vector<2x8xf32> to vector<2xf32>
    %32 = vector.shape_cast %31 : vector<2xf32> to vector<2x1xf32>
    %33 = vector.broadcast %32 : vector<2x1xf32> to vector<2x8xf32>
    %34 = arith.divf %30, %33 : vector<2x8xf32>
    %c0_17 = arith.constant 0 : index
    %c8 = arith.constant 8 : index
    %35 = vector.load %arg6[%c0_17, %c8] : memref<2x32xf32, #tpu.memory_space<vmem>>, vector<2x8xf32>
    tpu.vector_store %arg6[%c0_17, %c8], %34 {strides = array<i32>} : memref<2x32xf32, #tpu.memory_space<vmem>>, vector<2x8xf32>,
    %36 = vector.extract_strided_slice %13 {offsets = [0, 16], sizes = [2, 8], strides = [1, 1]} : vector<2x32xf32> to vector<2x8xf32>
    %cst_18 = arith.constant dense<0xFF800000> : vector<2xf32>
    %37 = vector.multi_reduction <maximumf>, %36, %cst_18 [1] : vector<2x8xf32> to vector<2xf32>
    %38 = vector.shape_cast %37 : vector<2xf32> to vector<2x1xf32>
    %39 = vector.broadcast %38 : vector<2x1xf32> to vector<2x8xf32>
    %40 = arith.subf %36, %39 : vector<2x8xf32>
    %41 = math.exp %40 : vector<2x8xf32>
    %cst_19 = arith.constant dense<0.000000e+00> : vector<2xf32>
    %42 = vector.multi_reduction <add>, %41, %cst_19 [1] : vector<2x8xf32> to vector<2xf32>
    %43 = vector.shape_cast %42 : vector<2xf32> to vector<2x1xf32>
    %44 = vector.broadcast %43 : vector<2x1xf32> to vector<2x8xf32>
    %45 = arith.divf %41, %44 : vector<2x8xf32>
    %c0_20 = arith.constant 0 : index
    %c16 = arith.constant 16 : index
    %46 = vector.load %arg6[%c0_20, %c16] : memref<2x32xf32, #tpu.memory_space<vmem>>, vector<2x8xf32>
    tpu.vector_store %arg6[%c0_20, %c16], %45 {strides = array<i32>} : memref<2x32xf32, #tpu.memory_space<vmem>>, vector<2x8xf32>,
    %47 = vector.extract_strided_slice %13 {offsets = [0, 24], sizes = [2, 8], strides = [1, 1]} : vector<2x32xf32> to vector<2x8xf32>
    %cst_21 = arith.constant dense<0xFF800000> : vector<2xf32>
    %48 = vector.multi_reduction <maximumf>, %47, %cst_21 [1] : vector<2x8xf32> to vector<2xf32>
    %49 = vector.shape_cast %48 : vector<2xf32> to vector<2x1xf32>
    %50 = vector.broadcast %49 : vector<2x1xf32> to vector<2x8xf32>
    %51 = arith.subf %47, %50 : vector<2x8xf32>
    %52 = math.exp %51 : vector<2x8xf32>
    %cst_22 = arith.constant dense<0.000000e+00> : vector<2xf32>
    %53 = vector.multi_reduction <add>, %52, %cst_22 [1] : vector<2x8xf32> to vector<2xf32>
    %54 = vector.shape_cast %53 : vector<2xf32> to vector<2x1xf32>
    %55 = vector.broadcast %54 : vector<2x1xf32> to vector<2x8xf32>
    %56 = arith.divf %52, %55 : vector<2x8xf32>
    %c0_23 = arith.constant 0 : index
    %c24 = arith.constant 24 : index
    %57 = vector.load %arg6[%c0_23, %c24] : memref<2x32xf32, #tpu.memory_space<vmem>>, vector<2x8xf32>
    tpu.vector_store %arg6[%c0_23, %c24], %56 {strides = array<i32>} : memref<2x32xf32, #tpu.memory_space<vmem>>, vector<2x8xf32>,
    return
  }
  func.func @transform_0(%arg0: i32) -> (i32, i32) {
    %c0_i32 = arith.constant 0 : i32
    %c0_i32_0 = arith.constant 0 : i32
    return %arg0, %c0_i32 : i32, i32
  }
  func.func @transform_1(%arg0: i32) -> (i32, i32) {
    %c0_i32 = arith.constant 0 : i32
    %c0_i32_0 = arith.constant 0 : i32
    %c0_i32_1 = arith.constant 0 : i32
    return %c0_i32, %c0_i32_0 : i32, i32
  }
  func.func @transform_2(%arg0: i32) -> (i32, i32) {
    %c0_i32 = arith.constant 0 : i32
    %c0_i32_0 = arith.constant 0 : i32
    %c0_i32_1 = arith.constant 0 : i32
    return %c0_i32, %c0_i32_0 : i32, i32
  }
  func.func @transform_3(%arg0: i32) -> (i32, i32) {
    %c0_i32 = arith.constant 0 : i32
    %c0_i32_0 = arith.constant 0 : i32
    %c0_i32_1 = arith.constant 0 : i32
    return %c0_i32, %c0_i32_0 : i32, i32
  }
  func.func @transform_4(%arg0: i32) -> (i32, i32) {
    %c0_i32 = arith.constant 0 : i32
    %c0_i32_0 = arith.constant 0 : i32
    %c0_i32_1 = arith.constant 0 : i32
    return %c0_i32, %c0_i32_0 : i32, i32
  }
  func.func @transform_5(%arg0: i32) -> (i32, i32) {
    %c0_i32 = arith.constant 0 : i32
    %c0_i32_0 = arith.constant 0 : i32
    return %arg0, %c0_i32 : i32, i32
  }
}

module attributes {stable_mosaic.version = 11 : i64} {
  func.func @_conv_fused_kernel(%arg0: i32, %arg1: memref<25x8x100xbf16, #tpu.memory_space<vmem>>, %arg2: memref<100x32xbf16, #tpu.memory_space<vmem>>, %arg3: memref<1x32xf32, #tpu.memory_space<vmem>>, %arg4: memref<25x32x64xbf16, #tpu.memory_space<vmem>>, %arg5: memref<1x64xf32, #tpu.memory_space<vmem>>, %arg6: memref<8x64xbf16, #tpu.memory_space<vmem>>) attributes {dimension_semantics = [#tpu.dimension_semantics<parallel>], iteration_bounds = array<i64: 1>, scalar_prefetch = 0 : i64, scratch_operands = 0 : i64, tpu.core_type = #tpu.core_type<tc>, window_params = [{transform_indices = @transform_0, window_bounds = array<i64: 25, 8, 100>}, {pipeline_mode = #tpu.pipeline_mode<synchronous>, transform_indices = @transform_1, window_bounds = array<i64: 100, 32>}, {pipeline_mode = #tpu.pipeline_mode<synchronous>, transform_indices = @transform_2, window_bounds = array<i64: 1, 32>}, {pipeline_mode = #tpu.pipeline_mode<synchronous>, transform_indices = @transform_3, window_bounds = array<i64: 25, 32, 64>}, {pipeline_mode = #tpu.pipeline_mode<synchronous>, transform_indices = @transform_4, window_bounds = array<i64: 1, 64>}, {transform_indices = @transform_5, window_bounds = array<i64: 8, 64>}]} {
    %c0 = arith.constant 0 : index
    %c0_0 = arith.constant 0 : index
    %c0_1 = arith.constant 0 : index
    %0 = vector.load %arg1[%c0, %c0_0, %c0_1] : memref<25x8x100xbf16, #tpu.memory_space<vmem>>, vector<25x8x100xbf16>
    %1 = vector.shape_cast %0 : vector<25x8x100xbf16> to vector<200x100xbf16>
    %c0_2 = arith.constant 0 : index
    %c0_3 = arith.constant 0 : index
    %2 = vector.load %arg2[%c0_2, %c0_3] : memref<100x32xbf16, #tpu.memory_space<vmem>>, vector<100x32xbf16>
    %cst = arith.constant dense<0.000000e+00> : vector<200x32xf32>
    %3 = tpu.matmul %1, %2, %cst {dimension_numbers = #tpu.dot_dimension_numbers<[1], [0], [0], [1], [0, 0, 1, 1], [], []>} : vector<200x100xbf16>, vector<100x32xbf16>, vector<200x32xf32> -> vector<200x32xf32>
    %c0_4 = arith.constant 0 : index
    %c0_5 = arith.constant 0 : index
    %4 = vector.load %arg3[%c0_4, %c0_5] : memref<1x32xf32, #tpu.memory_space<vmem>>, vector<1x32xf32>
    %5 = vector.broadcast %4 : vector<1x32xf32> to vector<200x32xf32>
    %6 = arith.addf %3, %5 : vector<200x32xf32>
    %cst_6 = arith.constant 0.000000e+00 : f32
    %7 = vector.broadcast %cst_6 : f32 to vector<200x32xf32>
    %8 = arith.maximumf %6, %7 : vector<200x32xf32>
    %9 = arith.truncf %8 : vector<200x32xf32> to vector<200x32xbf16>
    %cst_7 = arith.constant 0.000000e+00 : f32
    %10 = vector.broadcast %cst_7 : f32 to vector<8x64xf32>
    %11 = vector.extract_strided_slice %9 {offsets = [0, 0], sizes = [8, 32], strides = [1, 1]} : vector<200x32xbf16> to vector<8x32xbf16>
    %c0_8 = arith.constant 0 : index
    %c0_9 = arith.constant 0 : index
    %c0_10 = arith.constant 0 : index
    %12 = vector.load %arg4[%c0_8, %c0_9, %c0_10] : memref<25x32x64xbf16, #tpu.memory_space<vmem>>, vector<1x32x64xbf16>
    %13 = vector.shape_cast %12 : vector<1x32x64xbf16> to vector<32x64xbf16>
    %cst_11 = arith.constant dense<0.000000e+00> : vector<8x64xf32>
    %14 = tpu.matmul %11, %13, %cst_11 {dimension_numbers = #tpu.dot_dimension_numbers<[1], [0], [0], [1], [0, 0, 1, 1], [], []>} : vector<8x32xbf16>, vector<32x64xbf16>, vector<8x64xf32> -> vector<8x64xf32>
    %15 = arith.addf %10, %14 : vector<8x64xf32>
    %16 = vector.extract_strided_slice %9 {offsets = [8, 0], sizes = [8, 32], strides = [1, 1]} : vector<200x32xbf16> to vector<8x32xbf16>
    %c1 = arith.constant 1 : index
    %c0_12 = arith.constant 0 : index
    %c0_13 = arith.constant 0 : index
    %17 = vector.load %arg4[%c1, %c0_12, %c0_13] : memref<25x32x64xbf16, #tpu.memory_space<vmem>>, vector<1x32x64xbf16>
    %18 = vector.shape_cast %17 : vector<1x32x64xbf16> to vector<32x64xbf16>
    %cst_14 = arith.constant dense<0.000000e+00> : vector<8x64xf32>
    %19 = tpu.matmul %16, %18, %cst_14 {dimension_numbers = #tpu.dot_dimension_numbers<[1], [0], [0], [1], [0, 0, 1, 1], [], []>} : vector<8x32xbf16>, vector<32x64xbf16>, vector<8x64xf32> -> vector<8x64xf32>
    %20 = arith.addf %15, %19 : vector<8x64xf32>
    %21 = vector.extract_strided_slice %9 {offsets = [16, 0], sizes = [8, 32], strides = [1, 1]} : vector<200x32xbf16> to vector<8x32xbf16>
    %c2 = arith.constant 2 : index
    %c0_15 = arith.constant 0 : index
    %c0_16 = arith.constant 0 : index
    %22 = vector.load %arg4[%c2, %c0_15, %c0_16] : memref<25x32x64xbf16, #tpu.memory_space<vmem>>, vector<1x32x64xbf16>
    %23 = vector.shape_cast %22 : vector<1x32x64xbf16> to vector<32x64xbf16>
    %cst_17 = arith.constant dense<0.000000e+00> : vector<8x64xf32>
    %24 = tpu.matmul %21, %23, %cst_17 {dimension_numbers = #tpu.dot_dimension_numbers<[1], [0], [0], [1], [0, 0, 1, 1], [], []>} : vector<8x32xbf16>, vector<32x64xbf16>, vector<8x64xf32> -> vector<8x64xf32>
    %25 = arith.addf %20, %24 : vector<8x64xf32>
    %26 = vector.extract_strided_slice %9 {offsets = [24, 0], sizes = [8, 32], strides = [1, 1]} : vector<200x32xbf16> to vector<8x32xbf16>
    %c3 = arith.constant 3 : index
    %c0_18 = arith.constant 0 : index
    %c0_19 = arith.constant 0 : index
    %27 = vector.load %arg4[%c3, %c0_18, %c0_19] : memref<25x32x64xbf16, #tpu.memory_space<vmem>>, vector<1x32x64xbf16>
    %28 = vector.shape_cast %27 : vector<1x32x64xbf16> to vector<32x64xbf16>
    %cst_20 = arith.constant dense<0.000000e+00> : vector<8x64xf32>
    %29 = tpu.matmul %26, %28, %cst_20 {dimension_numbers = #tpu.dot_dimension_numbers<[1], [0], [0], [1], [0, 0, 1, 1], [], []>} : vector<8x32xbf16>, vector<32x64xbf16>, vector<8x64xf32> -> vector<8x64xf32>
    %30 = arith.addf %25, %29 : vector<8x64xf32>
    %31 = vector.extract_strided_slice %9 {offsets = [32, 0], sizes = [8, 32], strides = [1, 1]} : vector<200x32xbf16> to vector<8x32xbf16>
    %c4 = arith.constant 4 : index
    %c0_21 = arith.constant 0 : index
    %c0_22 = arith.constant 0 : index
    %32 = vector.load %arg4[%c4, %c0_21, %c0_22] : memref<25x32x64xbf16, #tpu.memory_space<vmem>>, vector<1x32x64xbf16>
    %33 = vector.shape_cast %32 : vector<1x32x64xbf16> to vector<32x64xbf16>
    %cst_23 = arith.constant dense<0.000000e+00> : vector<8x64xf32>
    %34 = tpu.matmul %31, %33, %cst_23 {dimension_numbers = #tpu.dot_dimension_numbers<[1], [0], [0], [1], [0, 0, 1, 1], [], []>} : vector<8x32xbf16>, vector<32x64xbf16>, vector<8x64xf32> -> vector<8x64xf32>
    %35 = arith.addf %30, %34 : vector<8x64xf32>
    %36 = vector.extract_strided_slice %9 {offsets = [40, 0], sizes = [8, 32], strides = [1, 1]} : vector<200x32xbf16> to vector<8x32xbf16>
    %c5 = arith.constant 5 : index
    %c0_24 = arith.constant 0 : index
    %c0_25 = arith.constant 0 : index
    %37 = vector.load %arg4[%c5, %c0_24, %c0_25] : memref<25x32x64xbf16, #tpu.memory_space<vmem>>, vector<1x32x64xbf16>
    %38 = vector.shape_cast %37 : vector<1x32x64xbf16> to vector<32x64xbf16>
    %cst_26 = arith.constant dense<0.000000e+00> : vector<8x64xf32>
    %39 = tpu.matmul %36, %38, %cst_26 {dimension_numbers = #tpu.dot_dimension_numbers<[1], [0], [0], [1], [0, 0, 1, 1], [], []>} : vector<8x32xbf16>, vector<32x64xbf16>, vector<8x64xf32> -> vector<8x64xf32>
    %40 = arith.addf %35, %39 : vector<8x64xf32>
    %41 = vector.extract_strided_slice %9 {offsets = [48, 0], sizes = [8, 32], strides = [1, 1]} : vector<200x32xbf16> to vector<8x32xbf16>
    %c6 = arith.constant 6 : index
    %c0_27 = arith.constant 0 : index
    %c0_28 = arith.constant 0 : index
    %42 = vector.load %arg4[%c6, %c0_27, %c0_28] : memref<25x32x64xbf16, #tpu.memory_space<vmem>>, vector<1x32x64xbf16>
    %43 = vector.shape_cast %42 : vector<1x32x64xbf16> to vector<32x64xbf16>
    %cst_29 = arith.constant dense<0.000000e+00> : vector<8x64xf32>
    %44 = tpu.matmul %41, %43, %cst_29 {dimension_numbers = #tpu.dot_dimension_numbers<[1], [0], [0], [1], [0, 0, 1, 1], [], []>} : vector<8x32xbf16>, vector<32x64xbf16>, vector<8x64xf32> -> vector<8x64xf32>
    %45 = arith.addf %40, %44 : vector<8x64xf32>
    %46 = vector.extract_strided_slice %9 {offsets = [56, 0], sizes = [8, 32], strides = [1, 1]} : vector<200x32xbf16> to vector<8x32xbf16>
    %c7 = arith.constant 7 : index
    %c0_30 = arith.constant 0 : index
    %c0_31 = arith.constant 0 : index
    %47 = vector.load %arg4[%c7, %c0_30, %c0_31] : memref<25x32x64xbf16, #tpu.memory_space<vmem>>, vector<1x32x64xbf16>
    %48 = vector.shape_cast %47 : vector<1x32x64xbf16> to vector<32x64xbf16>
    %cst_32 = arith.constant dense<0.000000e+00> : vector<8x64xf32>
    %49 = tpu.matmul %46, %48, %cst_32 {dimension_numbers = #tpu.dot_dimension_numbers<[1], [0], [0], [1], [0, 0, 1, 1], [], []>} : vector<8x32xbf16>, vector<32x64xbf16>, vector<8x64xf32> -> vector<8x64xf32>
    %50 = arith.addf %45, %49 : vector<8x64xf32>
    %51 = vector.extract_strided_slice %9 {offsets = [64, 0], sizes = [8, 32], strides = [1, 1]} : vector<200x32xbf16> to vector<8x32xbf16>
    %c8 = arith.constant 8 : index
    %c0_33 = arith.constant 0 : index
    %c0_34 = arith.constant 0 : index
    %52 = vector.load %arg4[%c8, %c0_33, %c0_34] : memref<25x32x64xbf16, #tpu.memory_space<vmem>>, vector<1x32x64xbf16>
    %53 = vector.shape_cast %52 : vector<1x32x64xbf16> to vector<32x64xbf16>
    %cst_35 = arith.constant dense<0.000000e+00> : vector<8x64xf32>
    %54 = tpu.matmul %51, %53, %cst_35 {dimension_numbers = #tpu.dot_dimension_numbers<[1], [0], [0], [1], [0, 0, 1, 1], [], []>} : vector<8x32xbf16>, vector<32x64xbf16>, vector<8x64xf32> -> vector<8x64xf32>
    %55 = arith.addf %50, %54 : vector<8x64xf32>
    %56 = vector.extract_strided_slice %9 {offsets = [72, 0], sizes = [8, 32], strides = [1, 1]} : vector<200x32xbf16> to vector<8x32xbf16>
    %c9 = arith.constant 9 : index
    %c0_36 = arith.constant 0 : index
    %c0_37 = arith.constant 0 : index
    %57 = vector.load %arg4[%c9, %c0_36, %c0_37] : memref<25x32x64xbf16, #tpu.memory_space<vmem>>, vector<1x32x64xbf16>
    %58 = vector.shape_cast %57 : vector<1x32x64xbf16> to vector<32x64xbf16>
    %cst_38 = arith.constant dense<0.000000e+00> : vector<8x64xf32>
    %59 = tpu.matmul %56, %58, %cst_38 {dimension_numbers = #tpu.dot_dimension_numbers<[1], [0], [0], [1], [0, 0, 1, 1], [], []>} : vector<8x32xbf16>, vector<32x64xbf16>, vector<8x64xf32> -> vector<8x64xf32>
    %60 = arith.addf %55, %59 : vector<8x64xf32>
    %61 = vector.extract_strided_slice %9 {offsets = [80, 0], sizes = [8, 32], strides = [1, 1]} : vector<200x32xbf16> to vector<8x32xbf16>
    %c10 = arith.constant 10 : index
    %c0_39 = arith.constant 0 : index
    %c0_40 = arith.constant 0 : index
    %62 = vector.load %arg4[%c10, %c0_39, %c0_40] : memref<25x32x64xbf16, #tpu.memory_space<vmem>>, vector<1x32x64xbf16>
    %63 = vector.shape_cast %62 : vector<1x32x64xbf16> to vector<32x64xbf16>
    %cst_41 = arith.constant dense<0.000000e+00> : vector<8x64xf32>
    %64 = tpu.matmul %61, %63, %cst_41 {dimension_numbers = #tpu.dot_dimension_numbers<[1], [0], [0], [1], [0, 0, 1, 1], [], []>} : vector<8x32xbf16>, vector<32x64xbf16>, vector<8x64xf32> -> vector<8x64xf32>
    %65 = arith.addf %60, %64 : vector<8x64xf32>
    %66 = vector.extract_strided_slice %9 {offsets = [88, 0], sizes = [8, 32], strides = [1, 1]} : vector<200x32xbf16> to vector<8x32xbf16>
    %c11 = arith.constant 11 : index
    %c0_42 = arith.constant 0 : index
    %c0_43 = arith.constant 0 : index
    %67 = vector.load %arg4[%c11, %c0_42, %c0_43] : memref<25x32x64xbf16, #tpu.memory_space<vmem>>, vector<1x32x64xbf16>
    %68 = vector.shape_cast %67 : vector<1x32x64xbf16> to vector<32x64xbf16>
    %cst_44 = arith.constant dense<0.000000e+00> : vector<8x64xf32>
    %69 = tpu.matmul %66, %68, %cst_44 {dimension_numbers = #tpu.dot_dimension_numbers<[1], [0], [0], [1], [0, 0, 1, 1], [], []>} : vector<8x32xbf16>, vector<32x64xbf16>, vector<8x64xf32> -> vector<8x64xf32>
    %70 = arith.addf %65, %69 : vector<8x64xf32>
    %71 = vector.extract_strided_slice %9 {offsets = [96, 0], sizes = [8, 32], strides = [1, 1]} : vector<200x32xbf16> to vector<8x32xbf16>
    %c12 = arith.constant 12 : index
    %c0_45 = arith.constant 0 : index
    %c0_46 = arith.constant 0 : index
    %72 = vector.load %arg4[%c12, %c0_45, %c0_46] : memref<25x32x64xbf16, #tpu.memory_space<vmem>>, vector<1x32x64xbf16>
    %73 = vector.shape_cast %72 : vector<1x32x64xbf16> to vector<32x64xbf16>
    %cst_47 = arith.constant dense<0.000000e+00> : vector<8x64xf32>
    %74 = tpu.matmul %71, %73, %cst_47 {dimension_numbers = #tpu.dot_dimension_numbers<[1], [0], [0], [1], [0, 0, 1, 1], [], []>} : vector<8x32xbf16>, vector<32x64xbf16>, vector<8x64xf32> -> vector<8x64xf32>
    %75 = arith.addf %70, %74 : vector<8x64xf32>
    %76 = vector.extract_strided_slice %9 {offsets = [104, 0], sizes = [8, 32], strides = [1, 1]} : vector<200x32xbf16> to vector<8x32xbf16>
    %c13 = arith.constant 13 : index
    %c0_48 = arith.constant 0 : index
    %c0_49 = arith.constant 0 : index
    %77 = vector.load %arg4[%c13, %c0_48, %c0_49] : memref<25x32x64xbf16, #tpu.memory_space<vmem>>, vector<1x32x64xbf16>
    %78 = vector.shape_cast %77 : vector<1x32x64xbf16> to vector<32x64xbf16>
    %cst_50 = arith.constant dense<0.000000e+00> : vector<8x64xf32>
    %79 = tpu.matmul %76, %78, %cst_50 {dimension_numbers = #tpu.dot_dimension_numbers<[1], [0], [0], [1], [0, 0, 1, 1], [], []>} : vector<8x32xbf16>, vector<32x64xbf16>, vector<8x64xf32> -> vector<8x64xf32>
    %80 = arith.addf %75, %79 : vector<8x64xf32>
    %81 = vector.extract_strided_slice %9 {offsets = [112, 0], sizes = [8, 32], strides = [1, 1]} : vector<200x32xbf16> to vector<8x32xbf16>
    %c14 = arith.constant 14 : index
    %c0_51 = arith.constant 0 : index
    %c0_52 = arith.constant 0 : index
    %82 = vector.load %arg4[%c14, %c0_51, %c0_52] : memref<25x32x64xbf16, #tpu.memory_space<vmem>>, vector<1x32x64xbf16>
    %83 = vector.shape_cast %82 : vector<1x32x64xbf16> to vector<32x64xbf16>
    %cst_53 = arith.constant dense<0.000000e+00> : vector<8x64xf32>
    %84 = tpu.matmul %81, %83, %cst_53 {dimension_numbers = #tpu.dot_dimension_numbers<[1], [0], [0], [1], [0, 0, 1, 1], [], []>} : vector<8x32xbf16>, vector<32x64xbf16>, vector<8x64xf32> -> vector<8x64xf32>
    %85 = arith.addf %80, %84 : vector<8x64xf32>
    %86 = vector.extract_strided_slice %9 {offsets = [120, 0], sizes = [8, 32], strides = [1, 1]} : vector<200x32xbf16> to vector<8x32xbf16>
    %c15 = arith.constant 15 : index
    %c0_54 = arith.constant 0 : index
    %c0_55 = arith.constant 0 : index
    %87 = vector.load %arg4[%c15, %c0_54, %c0_55] : memref<25x32x64xbf16, #tpu.memory_space<vmem>>, vector<1x32x64xbf16>
    %88 = vector.shape_cast %87 : vector<1x32x64xbf16> to vector<32x64xbf16>
    %cst_56 = arith.constant dense<0.000000e+00> : vector<8x64xf32>
    %89 = tpu.matmul %86, %88, %cst_56 {dimension_numbers = #tpu.dot_dimension_numbers<[1], [0], [0], [1], [0, 0, 1, 1], [], []>} : vector<8x32xbf16>, vector<32x64xbf16>, vector<8x64xf32> -> vector<8x64xf32>
    %90 = arith.addf %85, %89 : vector<8x64xf32>
    %91 = vector.extract_strided_slice %9 {offsets = [128, 0], sizes = [8, 32], strides = [1, 1]} : vector<200x32xbf16> to vector<8x32xbf16>
    %c16 = arith.constant 16 : index
    %c0_57 = arith.constant 0 : index
    %c0_58 = arith.constant 0 : index
    %92 = vector.load %arg4[%c16, %c0_57, %c0_58] : memref<25x32x64xbf16, #tpu.memory_space<vmem>>, vector<1x32x64xbf16>
    %93 = vector.shape_cast %92 : vector<1x32x64xbf16> to vector<32x64xbf16>
    %cst_59 = arith.constant dense<0.000000e+00> : vector<8x64xf32>
    %94 = tpu.matmul %91, %93, %cst_59 {dimension_numbers = #tpu.dot_dimension_numbers<[1], [0], [0], [1], [0, 0, 1, 1], [], []>} : vector<8x32xbf16>, vector<32x64xbf16>, vector<8x64xf32> -> vector<8x64xf32>
    %95 = arith.addf %90, %94 : vector<8x64xf32>
    %96 = vector.extract_strided_slice %9 {offsets = [136, 0], sizes = [8, 32], strides = [1, 1]} : vector<200x32xbf16> to vector<8x32xbf16>
    %c17 = arith.constant 17 : index
    %c0_60 = arith.constant 0 : index
    %c0_61 = arith.constant 0 : index
    %97 = vector.load %arg4[%c17, %c0_60, %c0_61] : memref<25x32x64xbf16, #tpu.memory_space<vmem>>, vector<1x32x64xbf16>
    %98 = vector.shape_cast %97 : vector<1x32x64xbf16> to vector<32x64xbf16>
    %cst_62 = arith.constant dense<0.000000e+00> : vector<8x64xf32>
    %99 = tpu.matmul %96, %98, %cst_62 {dimension_numbers = #tpu.dot_dimension_numbers<[1], [0], [0], [1], [0, 0, 1, 1], [], []>} : vector<8x32xbf16>, vector<32x64xbf16>, vector<8x64xf32> -> vector<8x64xf32>
    %100 = arith.addf %95, %99 : vector<8x64xf32>
    %101 = vector.extract_strided_slice %9 {offsets = [144, 0], sizes = [8, 32], strides = [1, 1]} : vector<200x32xbf16> to vector<8x32xbf16>
    %c18 = arith.constant 18 : index
    %c0_63 = arith.constant 0 : index
    %c0_64 = arith.constant 0 : index
    %102 = vector.load %arg4[%c18, %c0_63, %c0_64] : memref<25x32x64xbf16, #tpu.memory_space<vmem>>, vector<1x32x64xbf16>
    %103 = vector.shape_cast %102 : vector<1x32x64xbf16> to vector<32x64xbf16>
    %cst_65 = arith.constant dense<0.000000e+00> : vector<8x64xf32>
    %104 = tpu.matmul %101, %103, %cst_65 {dimension_numbers = #tpu.dot_dimension_numbers<[1], [0], [0], [1], [0, 0, 1, 1], [], []>} : vector<8x32xbf16>, vector<32x64xbf16>, vector<8x64xf32> -> vector<8x64xf32>
    %105 = arith.addf %100, %104 : vector<8x64xf32>
    %106 = vector.extract_strided_slice %9 {offsets = [152, 0], sizes = [8, 32], strides = [1, 1]} : vector<200x32xbf16> to vector<8x32xbf16>
    %c19 = arith.constant 19 : index
    %c0_66 = arith.constant 0 : index
    %c0_67 = arith.constant 0 : index
    %107 = vector.load %arg4[%c19, %c0_66, %c0_67] : memref<25x32x64xbf16, #tpu.memory_space<vmem>>, vector<1x32x64xbf16>
    %108 = vector.shape_cast %107 : vector<1x32x64xbf16> to vector<32x64xbf16>
    %cst_68 = arith.constant dense<0.000000e+00> : vector<8x64xf32>
    %109 = tpu.matmul %106, %108, %cst_68 {dimension_numbers = #tpu.dot_dimension_numbers<[1], [0], [0], [1], [0, 0, 1, 1], [], []>} : vector<8x32xbf16>, vector<32x64xbf16>, vector<8x64xf32> -> vector<8x64xf32>
    %110 = arith.addf %105, %109 : vector<8x64xf32>
    %111 = vector.extract_strided_slice %9 {offsets = [160, 0], sizes = [8, 32], strides = [1, 1]} : vector<200x32xbf16> to vector<8x32xbf16>
    %c20 = arith.constant 20 : index
    %c0_69 = arith.constant 0 : index
    %c0_70 = arith.constant 0 : index
    %112 = vector.load %arg4[%c20, %c0_69, %c0_70] : memref<25x32x64xbf16, #tpu.memory_space<vmem>>, vector<1x32x64xbf16>
    %113 = vector.shape_cast %112 : vector<1x32x64xbf16> to vector<32x64xbf16>
    %cst_71 = arith.constant dense<0.000000e+00> : vector<8x64xf32>
    %114 = tpu.matmul %111, %113, %cst_71 {dimension_numbers = #tpu.dot_dimension_numbers<[1], [0], [0], [1], [0, 0, 1, 1], [], []>} : vector<8x32xbf16>, vector<32x64xbf16>, vector<8x64xf32> -> vector<8x64xf32>
    %115 = arith.addf %110, %114 : vector<8x64xf32>
    %116 = vector.extract_strided_slice %9 {offsets = [168, 0], sizes = [8, 32], strides = [1, 1]} : vector<200x32xbf16> to vector<8x32xbf16>
    %c21 = arith.constant 21 : index
    %c0_72 = arith.constant 0 : index
    %c0_73 = arith.constant 0 : index
    %117 = vector.load %arg4[%c21, %c0_72, %c0_73] : memref<25x32x64xbf16, #tpu.memory_space<vmem>>, vector<1x32x64xbf16>
    %118 = vector.shape_cast %117 : vector<1x32x64xbf16> to vector<32x64xbf16>
    %cst_74 = arith.constant dense<0.000000e+00> : vector<8x64xf32>
    %119 = tpu.matmul %116, %118, %cst_74 {dimension_numbers = #tpu.dot_dimension_numbers<[1], [0], [0], [1], [0, 0, 1, 1], [], []>} : vector<8x32xbf16>, vector<32x64xbf16>, vector<8x64xf32> -> vector<8x64xf32>
    %120 = arith.addf %115, %119 : vector<8x64xf32>
    %121 = vector.extract_strided_slice %9 {offsets = [176, 0], sizes = [8, 32], strides = [1, 1]} : vector<200x32xbf16> to vector<8x32xbf16>
    %c22 = arith.constant 22 : index
    %c0_75 = arith.constant 0 : index
    %c0_76 = arith.constant 0 : index
    %122 = vector.load %arg4[%c22, %c0_75, %c0_76] : memref<25x32x64xbf16, #tpu.memory_space<vmem>>, vector<1x32x64xbf16>
    %123 = vector.shape_cast %122 : vector<1x32x64xbf16> to vector<32x64xbf16>
    %cst_77 = arith.constant dense<0.000000e+00> : vector<8x64xf32>
    %124 = tpu.matmul %121, %123, %cst_77 {dimension_numbers = #tpu.dot_dimension_numbers<[1], [0], [0], [1], [0, 0, 1, 1], [], []>} : vector<8x32xbf16>, vector<32x64xbf16>, vector<8x64xf32> -> vector<8x64xf32>
    %125 = arith.addf %120, %124 : vector<8x64xf32>
    %126 = vector.extract_strided_slice %9 {offsets = [184, 0], sizes = [8, 32], strides = [1, 1]} : vector<200x32xbf16> to vector<8x32xbf16>
    %c23 = arith.constant 23 : index
    %c0_78 = arith.constant 0 : index
    %c0_79 = arith.constant 0 : index
    %127 = vector.load %arg4[%c23, %c0_78, %c0_79] : memref<25x32x64xbf16, #tpu.memory_space<vmem>>, vector<1x32x64xbf16>
    %128 = vector.shape_cast %127 : vector<1x32x64xbf16> to vector<32x64xbf16>
    %cst_80 = arith.constant dense<0.000000e+00> : vector<8x64xf32>
    %129 = tpu.matmul %126, %128, %cst_80 {dimension_numbers = #tpu.dot_dimension_numbers<[1], [0], [0], [1], [0, 0, 1, 1], [], []>} : vector<8x32xbf16>, vector<32x64xbf16>, vector<8x64xf32> -> vector<8x64xf32>
    %130 = arith.addf %125, %129 : vector<8x64xf32>
    %131 = vector.extract_strided_slice %9 {offsets = [192, 0], sizes = [8, 32], strides = [1, 1]} : vector<200x32xbf16> to vector<8x32xbf16>
    %c24 = arith.constant 24 : index
    %c0_81 = arith.constant 0 : index
    %c0_82 = arith.constant 0 : index
    %132 = vector.load %arg4[%c24, %c0_81, %c0_82] : memref<25x32x64xbf16, #tpu.memory_space<vmem>>, vector<1x32x64xbf16>
    %133 = vector.shape_cast %132 : vector<1x32x64xbf16> to vector<32x64xbf16>
    %cst_83 = arith.constant dense<0.000000e+00> : vector<8x64xf32>
    %134 = tpu.matmul %131, %133, %cst_83 {dimension_numbers = #tpu.dot_dimension_numbers<[1], [0], [0], [1], [0, 0, 1, 1], [], []>} : vector<8x32xbf16>, vector<32x64xbf16>, vector<8x64xf32> -> vector<8x64xf32>
    %135 = arith.addf %130, %134 : vector<8x64xf32>
    %c0_84 = arith.constant 0 : index
    %c0_85 = arith.constant 0 : index
    %136 = vector.load %arg5[%c0_84, %c0_85] : memref<1x64xf32, #tpu.memory_space<vmem>>, vector<1x64xf32>
    %137 = vector.broadcast %136 : vector<1x64xf32> to vector<8x64xf32>
    %138 = arith.addf %135, %137 : vector<8x64xf32>
    %cst_86 = arith.constant 0.000000e+00 : f32
    %139 = vector.broadcast %cst_86 : f32 to vector<8x64xf32>
    %140 = arith.maximumf %138, %139 : vector<8x64xf32>
    %141 = arith.truncf %140 : vector<8x64xf32> to vector<8x64xbf16>
    %c0_87 = arith.constant 0 : index
    %c0_88 = arith.constant 0 : index
    %142 = vector.load %arg6[%c0_87, %c0_88] : memref<8x64xbf16, #tpu.memory_space<vmem>>, vector<8x64xbf16>
    tpu.vector_store %arg6[%c0_87, %c0_88], %141 {strides = array<i32>} : memref<8x64xbf16, #tpu.memory_space<vmem>>, vector<8x64xbf16>,
    return
  }
  func.func @transform_0(%arg0: i32) -> (i32, i32, i32) {
    %c0_i32 = arith.constant 0 : i32
    %c0_i32_0 = arith.constant 0 : i32
    %c0_i32_1 = arith.constant 0 : i32
    return %c0_i32, %arg0, %c0_i32_0 : i32, i32, i32
  }
  func.func @transform_1(%arg0: i32) -> (i32, i32) {
    %c0_i32 = arith.constant 0 : i32
    %c0_i32_0 = arith.constant 0 : i32
    %c0_i32_1 = arith.constant 0 : i32
    return %c0_i32, %c0_i32_0 : i32, i32
  }
  func.func @transform_2(%arg0: i32) -> (i32, i32) {
    %c0_i32 = arith.constant 0 : i32
    %c0_i32_0 = arith.constant 0 : i32
    %c0_i32_1 = arith.constant 0 : i32
    return %c0_i32, %c0_i32_0 : i32, i32
  }
  func.func @transform_3(%arg0: i32) -> (i32, i32, i32) {
    %c0_i32 = arith.constant 0 : i32
    %c0_i32_0 = arith.constant 0 : i32
    %c0_i32_1 = arith.constant 0 : i32
    %c0_i32_2 = arith.constant 0 : i32
    return %c0_i32, %c0_i32_0, %c0_i32_1 : i32, i32, i32
  }
  func.func @transform_4(%arg0: i32) -> (i32, i32) {
    %c0_i32 = arith.constant 0 : i32
    %c0_i32_0 = arith.constant 0 : i32
    %c0_i32_1 = arith.constant 0 : i32
    return %c0_i32, %c0_i32_0 : i32, i32
  }
  func.func @transform_5(%arg0: i32) -> (i32, i32) {
    %c0_i32 = arith.constant 0 : i32
    %c0_i32_0 = arith.constant 0 : i32
    return %arg0, %c0_i32 : i32, i32
  }
}

</mosaic_0001>

<bundles_post_ra>
// kernel: dqn_forward.3
= control target key start
LH: loop header
LB: loop body
LE: loop exit
PB: predicated region body
PF: predicated region fallthrough
CT: control target
= control target key end

     0   :  { %v332_v0 = vmov 0.0   ;;  %vm333_vm0 = vmmov 0   ;;  %vm61_vm1 = vcmask 523264   ;;  %vm236_vm2 = vcmask 255168   ;;  %s426_s1 = inlined_call_operand.vmem [shape: bf16[64,64], index: 1, kind: input, shape index: {}]   ;;  %s427_s3 = inlined_call_operand.vmem [shape: bf16[64,32], index: 3, kind: input, shape index: {}]   ;;  %s428_s0 = inlined_call_operand.vmem [shape: bf16[2,64], index: 0, kind: input, shape index: {}]   ;;  %s429_s2 = inlined_call_operand.vmem [shape: f32[1,64], index: 2, kind: input, shape index: {}]   ;;  %s430_s4 = inlined_call_operand.vmem [shape: f32[1,32], index: 4, kind: input, shape index: {}]   ;;  %s431_s5 = inlined_call_operand.vmem [shape: f32[2,32], index: 5, kind: output, shape index: {}]  }
   0x1   :  { %279 = vmatprep.subr.bf16.mxu0 %v332_v0  ;;  %v308_v1 = vld [vmem:[%s426_s1 + $0x18] sm:$0xff]   ;;  %287 = vmatprep.mubr.msk.bf16.mxu0 %vm333_vm0, %v332_v0  ;;  %v309_v2 = vld [vmem:[%s426_s1 + $0x10] sm:$0xff]   ;;  %v310_v4 = vld [vmem:[%s426_s1 + $0x8] sm:$0xff]   ;;  %vm202_vm3 = vcmask 123968   ;;  %vm219_vm4 = vcmask 189568   ;;  %vm189_vm5 = vcmask 58368  }
   0x2   :  { %291 = vmatprep.subr.bf16.mxu1 %v332_v0  ;;  %299 = vmatprep.mubr.msk.bf16.mxu1 %vm333_vm0, %v332_v0  ;;  %v312_v3 = vld [vmem:[%s427_s3 + $0x18] sm:$0xff]   ;;  %v313_v5 = vld [vmem:[%s427_s3 + $0x10] sm:$0xff]   ;;  %v311_v6 = vld [vmem:[%s426_s1] sm:$0xff]  }
   0x3   :  { %280 = vmatpush3.bf16.msra.mxu0 %v308_v1  ;;  %292 = vmatpush3.bf16.msra.mxu1 %v312_v3  ;;  %v21_v7 = vld [vmem:[%s428_s0] sm:$0x1]  ;;  %v314_v8 = vld [vmem:[%s427_s3 + $0x8] sm:$0xff]  }
   0x4   :  { %281 = vmatprep.subr.bf16.mxu0 %v332_v0  ;;  %293 = vmatprep.subr.bf16.mxu1 %v332_v0  ;;  %v315_v9 = vld [vmem:[%s427_s3] sm:$0xff]   ;;  %s335_s3 = smov 112  }
   0x5   :  { %v257_v10 = vld [vmem:[%s429_s2] ss:$0 sm:$0xff]  ;;  %s334_s2 = smov 120  }
   0x6   :  { %v263_v18 = vld [vmem:[%s430_s4] ss:$0 sm:$0xff]  ;;  %s336_s4 = smov 104  }
   0x7   :  { %282 = vmatpush3.bf16.msra.mxu0 %v309_v2  ;;  %294 = vmatpush3.bf16.msra.mxu1 %v313_v5 }
   0x8   :  { %283 = vmatprep.subr.bf16.mxu0 %v332_v0  ;;  %295 = vmatprep.subr.bf16.mxu1 %v332_v0 }
   0xb   :  { %284 = vmatpush3.bf16.msra.mxu0 %v310_v4  ;;  %296 = vmatpush3.bf16.msra.mxu1 %v314_v8 }
   0xc   :  { %285 = vmatprep.subr.bf16.mxu0 %v332_v0  ;;  %297 = vmatprep.subr.bf16.mxu1 %v332_v0 }
   0xf   :  { %286 = vmatpush3.bf16.msra.mxu0 %v311_v6  ;;  %298 = vmatpush3.bf16.msra.mxu1 %v315_v9 }
  0x12   :  { %288 = vmatmul.mubr.msk.bf16.vlgmr.msra.gmra.mxu0 %vm61_vm1, %v21_v7 }
  0xd2   :  { %v99_v11 = vpop.f32.mrf.mxu0 }
  0xd3   :  { %v100_v12 = vadd.f32 %v257_v10, %v99_v11 }
  0xd4   :  { %v289_v13 = vpop.f32.mrf.mxu0 }
  0xd5   :  { %v105_v14 = vmax.f32 %v100_v12, 0.0 }
  0xd6   :  { %v102_v15 = vpop.f32.mrf.mxu0 }
  0xd7   :  { %v106_v16 = vpack.c.bf16 %v105_v14, %v105_v14 }
  0xd8   :  { %v290_v17 = vpop.f32.mrf.mxu0 }
  0xd9   :  { %300 = vmatmul.mubr.msk.bf16.vlgmr.msra.gmra.mxu1 %vm61_vm1, %v106_v16 }
 0x199   :  { %v183_v19 = vpop.f32.mrf.mxu1 }
 0x19a   :  { %v184_v20 = vadd.f32 %v263_v18, %v183_v19 }
 0x19b   :  { %v301_v21 = vpop.f32.mrf.mxu1 }
 0x19c   :  { %v237_v22 = vsel %vm236_vm2, %v184_v20, -inf  ;;  %v203_v23 = vsel %vm202_vm3, %v184_v20, -inf  ;;  %v220_v26 = vsel %vm219_vm4, %v184_v20, -inf  ;;  %v190_v27 = vsel %vm189_vm5, %v184_v20, -inf }
 0x19d   :  { %238 = vmax.xlane.f32.xlu1 %v237_v22  ;;  %204 = vmax.xlane.f32.xlu0 %v203_v23  ;;  %v186_v24 = vpop.f32.mrf.mxu1 }
 0x19f   :  { %v302_v25 = vpop.f32.mrf.mxu1 }
 0x1a1   :  { %221 = vmax.xlane.f32.xlu0 %v220_v26  ;;  %191 = vmax.xlane.f32.xlu1 %v190_v27 }
 0x226   :  { %v205_v28 = vpop.xlane.xlu0 %204  ;;  %v239_v30 = vpop.xlane.xlu1 %238 }
 0x227   :  { %v206_v29 = vsub.f32 %v184_v20, %v205_v28  ;;  %v240_v33 = vsub.f32 %v184_v20, %v239_v30 }
 0x229   :  { %v207_v31 = vmul.f32 1.442695, %v206_v29  ;;  %v241_v36 = vmul.f32 1.442695, %v240_v33 }
 0x22a   :  { %v222_v32 = vpop.xlane.xlu0 %221  ;;  %v192_v40 = vpop.xlane.xlu1 %191 }
 0x22b   :  { %v223_v34 = vsub.f32 %v184_v20, %v222_v32  ;;  %316 = vpow2.f32 %v207_v31  ;;  %v193_v41 = vsub.f32 %v184_v20, %v192_v40 }
 0x22d   :  { %v224_v35 = vmul.f32 1.442695, %v223_v34  ;;  %v194_v42 = vmul.f32 1.442695, %v193_v41 }
 0x22f   :  { %318 = vpow2.f32 %v224_v35 }
 0x230   :  { %320 = vpow2.f32 %v241_v36 }
 0x231   :  { %322 = vpow2.f32 %v194_v42 }
 0x238   :  { %v317_v37 = vpop.eup %316 }
 0x239   :  { %210 = vrot.lane.b32.xlu0 %v317_v37, %s334_s2 }
 0x23c   :  { %v319_v38 = vpop.eup %318 }
 0x23d   :  { %227 = vrot.lane.b32.xlu1 %v319_v38, %s335_s3  ;;  %v321_v39 = vpop.eup %320 }
 0x23e   :  { %v323_v43 = vpop.eup %322 }
 0x23f   :  { %v196_v44 = vsel %vm189_vm5, %v323_v43, 0.0 }
 0x241   :  { %244 = vrot.lane.b32.xlu1 %v321_v39, %s336_s4 }
 0x265   :  { %197 = vadd.xlane.f32.xlu1 %v196_v44 }
 0x2ab   :  { %v211_v45 = vpop.permute.xlu0 %210 }
 0x2ac   :  { %v213_v46 = vsel %vm189_vm5, %v211_v45, 0.0 }
 0x2ad   :  { %214 = vadd.xlane.f32.xlu0 %v213_v46 }
 0x2af   :  { %v228_v47 = vpop.permute.xlu1 %227 }
 0x2b0   :  { %v230_v48 = vsel %vm189_vm5, %v228_v47, 0.0 }
 0x2b1   :  { %231 = vadd.xlane.f32.xlu0 %v230_v48 }
 0x2b3   :  { %v245_v49 = vpop.permute.xlu1 %244 }
 0x2b4   :  { %v247_v50 = vsel %vm189_vm5, %v245_v49, 0.0 }
 0x2b5   :  { %248 = vadd.xlane.f32.xlu0 %v247_v50 }
 0x2ee   :  { %v198_v51 = vpop.xlane.xlu1 %197 }
 0x2ef   :  { %324 = vrcp.f32 %v198_v51 }
 0x2fc   :  { %v325_v52 = vpop.eup %324 }
 0x2fd   :  { %v200_v53 = vmul.f32 %v325_v52, %v323_v43 }
 0x2ff   :  { %201 = vst.msk [vmem:[%s431_s5] sm:$0x3] %vm189_vm5, %v200_v53 }
 0x336   :  { %v215_v54 = vpop.xlane.xlu0 %214 }
 0x337   :  { %326 = vrcp.f32 %v215_v54 }
 0x33a   :  { %v232_v55 = vpop.xlane.xlu0 %231 }
 0x33b   :  { %328 = vrcp.f32 %v232_v55 }
 0x33e   :  { %v249_v56 = vpop.xlane.xlu0 %248 }
 0x33f   :  { %330 = vrcp.f32 %v249_v56 }
 0x344   :  { %v327_v57 = vpop.eup %326 }
 0x345   :  { %v217_v58 = vmul.f32 %v327_v57, %v317_v37 }
 0x347   :  { %218 = vst.msk [vmem:[%s431_s5] sm:$0x3] %vm202_vm3, %v217_v58 }
 0x348   :  { %v329_v59 = vpop.eup %328 }
 0x349   :  { %v234_v60 = vmul.f32 %v329_v59, %v319_v38 }
 0x34b   :  { %235 = vst.msk [vmem:[%s431_s5] sm:$0x3] %vm219_vm4, %v234_v60 }
 0x34c   :  { %v331_v61 = vpop.eup %330 }
 0x34d   :  { %v251_v62 = vmul.f32 %v331_v61, %v321_v39 }
 0x34f   :  { %252 = vst.msk [vmem:[%s431_s5] sm:$0x3] %vm236_vm2, %v251_v62 }

// kernel: dqn_forward.2
= control target key start
LH: loop header
LB: loop body
LE: loop exit
PB: predicated region body
PF: predicated region fallthrough
CT: control target
= control target key end

     0   :  { %vm208_vm0 = vcmask 1041408   ;;  %v2588_v0 = vmov 0.0   ;;  %vm2589_vm1 = vmmov 0   ;;  %vm168_vm2 = vcmask 818176   ;;  %s3074_s1 = inlined_call_operand.vmem [shape: bf16[100,32], index: 1, kind: input, shape index: {}]   ;;  %s3075_s0 = inlined_call_operand.vmem [shape: bf16[25,8,100], index: 0, kind: input, shape index: {}]   ;;  %s3076_s3 = inlined_call_operand.vmem [shape: bf16[25,32,64], index: 3, kind: input, shape index: {}]   ;;  %s3077_s2 = inlined_call_operand.vmem [shape: f32[1,32], index: 2, kind: input, shape index: {}]   ;;  %s3078_s4 = inlined_call_operand.vmem [shape: f32[1,64], index: 4, kind: input, shape index: {}]   ;;  %s3079_s5 = inlined_call_operand.vmem [shape: bf16[8,64], index: 5, kind: output, shape index: {}]  }
   0x1   :  { %2250 = vmatprep.subr.bf16.mxu0 %v2588_v0  ;;  %v2518_v1 = vld [vmem:[%s3074_s1 + $0x30] ss:$0 sps:$4 sm:$0x33]   ;;  %2264 = vmatprep.mubr.msk.bf16.mxu0 %vm2589_vm1, %v2588_v0  ;;  %v2519_v3 = vld [vmem:[%s3074_s1 + $0x28] sm:$0xff]   ;;  %v2520_v4 = vld [vmem:[%s3074_s1 + $0x20] sm:$0xff]   ;;  %vm409_vm3 = vcmask 261120  }
   0x2   :  { %2316 = vmatprep.subr.bf16.mxu1 %v2588_v0  ;;  %2320 = vmatprep.mubr.msk.bf16.mxu1 %vm2589_vm1, %v2588_v0  ;;  %v210_v2 = vsel %vm208_vm0, %v2518_v1, 0  ;;  %v2521_v5 = vld [vmem:[%s3074_s1 + $0x18] sm:$0xff]   ;;  %v2522_v6 = vld [vmem:[%s3074_s1 + $0x10] sm:$0xff]   ;;  %v2523_v7 = vld [vmem:[%s3074_s1 + $0x8] sm:$0xff]   ;;  %vm1943_vm4 = vcmask 519168  }
   0x3   :  { %2251 = vmatpush3.bf16.msra.mxu0 %v210_v2  ;;  %v2524_v8 = vld [vmem:[%s3074_s1] sm:$0xff]   ;;  %v2526_v10 = vld [vmem:[%s3075_s0 + $0x8] sm:$0xff]   ;;  %v2527_v11 = vld [vmem:[%s3075_s0 + $0x10] sm:$0xff]  }
   0x4   :  { %2252 = vmatprep.subr.bf16.mxu0 %v2588_v0  ;;  %v2525_v9 = vld [vmem:[%s3075_s0] sm:$0xff]   ;;  %v2528_v12 = vld [vmem:[%s3075_s0 + $0x18] sm:$0xff]   ;;  %v2530_v14 = vld [vmem:[%s3075_s0 + $0x28] sm:$0xff]  }
   0x5   :  { %v2529_v13 = vld [vmem:[%s3075_s0 + $0x20] sm:$0xff]   ;;  %v2531_v15 = vld [vmem:[%s3075_s0 + $0x30] sm:$0xff]   ;;  %v2532_v16 = vld [vmem:[%s3075_s0 + $0x38] sm:$0xff]  }
   0x6   :  { %v2533_v17 = vld [vmem:[%s3075_s0 + $0x40] sm:$0xff]   ;;  %v2534_v18 = vld [vmem:[%s3075_s0 + $0x48] sm:$0xff]   ;;  %v2538_v19 = vld [vmem:[%s3076_s3 + $0x18] sm:$0xff]  }
   0x7   :  { %2253 = vmatpush3.bf16.msra.mxu0 %v2519_v3  ;;  %2317 = vmatpush3.bf16.msra.mxu1 %v2538_v19  ;;  %v2539_v20 = vld [vmem:[%s3076_s3 + $0x10] sm:$0xff]   ;;  %v2536_v22 = vld [vmem:[%s3075_s0 + $0x58] sm:$0xff]   ;;  %v2537_v23 = vld [vmem:[%s3075_s0 + $0x60] ss:$0 sps:$4 sm:$0xff]  }
   0x8   :  { %2254 = vmatprep.subr.bf16.mxu0 %v2588_v0  ;;  %2318 = vmatprep.subr.bf16.mxu1 %v2588_v0  ;;  %v2535_v21 = vld [vmem:[%s3075_s0 + $0x50] sm:$0xff]   ;;  %v2545_v24 = vld [vmem:[%s3076_s3 + $0x108] sm:$0xff]   ;;  %v2559_v25 = vld [vmem:[%s3076_s3 + $0x100] sm:$0xff]  }
   0x9   :  { %v2751_v26 = vld [vmem:[%s3077_s2] ss:$0 sm:$0xff]  ;;  %v2540_v37 = vld [vmem:[%s3076_s3 + $0x8] sm:$0xff]   ;;  %v2544_v54 = vld [vmem:[%s3076_s3 + $0x38] sm:$0xff]  }
   0xa   :  { %v2541_v41 = vld [vmem:[%s3076_s3] sm:$0xff]   ;;  %v2542_v44 = vld [vmem:[%s3076_s3 + $0x28] sm:$0xff]   ;;  %v2546_v58 = vld [vmem:[%s3076_s3 + $0x30] sm:$0xff]  }
   0xb   :  { %2255 = vmatpush3.bf16.msra.mxu0 %v2520_v4  ;;  %2319 = vmatpush3.bf16.msra.mxu1 %v2539_v20  ;;  %v2543_v49 = vld [vmem:[%s3076_s3 + $0x20] sm:$0xff]   ;;  %v2547_v61 = vld [vmem:[%s3076_s3 + $0x48] sm:$0xff]  }
   0xc   :  { %2256 = vmatprep.subr.bf16.mxu0 %v2588_v0  ;;  %2324 = vmatprep.subr.bf16.mxu1 %v2588_v0  ;;  %v2548_v4 = vld [vmem:[%s3076_s3 + $0x40] sm:$0xff]  }
   0xf   :  { %2257 = vmatpush3.bf16.msra.mxu0 %v2521_v5 }
  0x10   :  { %2258 = vmatprep.subr.bf16.mxu0 %v2588_v0 }
  0x13   :  { %2259 = vmatpush3.bf16.msra.mxu0 %v2522_v6 }
  0x14   :  { %2260 = vmatprep.subr.bf16.mxu0 %v2588_v0 }
  0x17   :  { %2261 = vmatpush3.bf16.msra.mxu0 %v2523_v7 }
  0x18   :  { %2262 = vmatprep.subr.bf16.mxu0 %v2588_v0 }
  0x1b   :  { %2263 = vmatpush3.bf16.msra.mxu0 %v2524_v8 }
  0x1c   :  { %2444 = vmatprep.subr.bf16.mxu0 %v2588_v0 }
  0x1e   :  { %2265 = vmatmul.mubr.msk.bf16.vlgmr.msra.gmra.mxu0 %vm168_vm2, %v2525_v9  ;;  %v2549_v9 = vld [vmem:[%s3076_s3 + $0x58] sm:$0xff]  }
  0x1f   :  { %2268 = vmatprep.mubr.msk.bf16.mxu0 %vm2589_vm1, %v2588_v0  ;;  %2445 = vmatpush3.bf16.msra.mxu0 %v2545_v24 }
  0x20   :  { %2446 = vmatprep.subr.bf16.mxu0 %v2588_v0 }
  0x23   :  { %2447 = vmatpush3.bf16.msra.mxu0 %v2559_v25 }
  0x24   :  { %2460 = vmatprep.subr.bf16.mxu0 %v2588_v0 }
  0x26   :  { %2269 = vmatmul.mubr.msk.bf16.gmra.mxu0 %vm168_vm2, %v2526_v10 }
  0x27   :  { %2272 = vmatprep.mubr.msk.bf16.mxu0 %vm2589_vm1, %v2588_v0 }
  0x2e   :  { %2273 = vmatmul.mubr.msk.bf16.gmra.mxu0 %vm168_vm2, %v2527_v11 }
  0x2f   :  { %2276 = vmatprep.mubr.msk.bf16.mxu0 %vm2589_vm1, %v2588_v0 }
  0x36   :  { %2277 = vmatmul.mubr.msk.bf16.gmra.mxu0 %vm168_vm2, %v2528_v12 }
  0x37   :  { %2280 = vmatprep.mubr.msk.bf16.mxu0 %vm2589_vm1, %v2588_v0 }
  0x3e   :  { %2281 = vmatmul.mubr.msk.bf16.gmra.mxu0 %vm168_vm2, %v2529_v13  ;;  %v2550_v13 = vld [vmem:[%s3076_s3 + $0x50] sm:$0xff]  }
  0x3f   :  { %2284 = vmatprep.mubr.msk.bf16.mxu0 %vm2589_vm1, %v2588_v0 }
  0x46   :  { %2285 = vmatmul.mubr.msk.bf16.gmra.mxu0 %vm168_vm2, %v2530_v14 }
  0x47   :  { %2288 = vmatprep.mubr.msk.bf16.mxu0 %vm2589_vm1, %v2588_v0 }
  0x4e   :  { %2289 = vmatmul.mubr.msk.bf16.gmra.mxu0 %vm168_vm2, %v2531_v15 }
  0x4f   :  { %2292 = vmatprep.mubr.msk.bf16.mxu0 %vm2589_vm1, %v2588_v0 }
  0x56   :  { %2293 = vmatmul.mubr.msk.bf16.gmra.mxu0 %vm168_vm2, %v2532_v16  ;;  %v2551_v16 = vld [vmem:[%s3076_s3 + $0x68] sm:$0xff]  }
  0x57   :  { %2296 = vmatprep.mubr.msk.bf16.mxu0 %vm2589_vm1, %v2588_v0 }
  0x5e   :  { %2297 = vmatmul.mubr.msk.bf16.gmra.mxu0 %vm168_vm2, %v2533_v17 }
  0x5f   :  { %2300 = vmatprep.mubr.msk.bf16.mxu0 %vm2589_vm1, %v2588_v0 }
  0x66   :  { %2301 = vmatmul.mubr.msk.bf16.gmra.mxu0 %vm168_vm2, %v2534_v18 }
  0x67   :  { %2304 = vmatprep.mubr.msk.bf16.mxu0 %vm2589_vm1, %v2588_v0 }
  0x6e   :  { %2305 = vmatmul.mubr.msk.bf16.gmra.mxu0 %vm168_vm2, %v2535_v21 }
  0x6f   :  { %2308 = vmatprep.mubr.msk.bf16.mxu0 %vm2589_vm1, %v2588_v0 }
  0x76   :  { %2309 = vmatmul.mubr.msk.bf16.gmra.mxu0 %vm168_vm2, %v2536_v22  ;;  %v2552_v22 = vld [vmem:[%s3076_s3 + $0x60] sm:$0xff]  }
  0x77   :  { %2312 = vmatprep.mubr.msk.bf16.mxu0 %vm2589_vm1, %v2588_v0 }
  0x7e   :  { %2313 = vmatmul.mubr.msk.bf16.gmra.mxu0 %vm168_vm2, %v2537_v23 }
  0x7f   :  { %2448 = vmatprep.mubr.msk.bf16.mxu0 %vm2589_vm1, %v2588_v0 }
  0xde   :  { %v246_v27 = vpop.f32.mrf.mxu0 }
  0xdf   :  { %v247_v29 = vadd.f32 %v2751_v26, %v246_v27 }
  0xe0   :  { %v2266_v28 = vpop.f32.mrf.mxu0 }
  0xe1   :  { %v348_v33 = vmax.f32 %v247_v29, 0.0  ;;  %v2553_v28 = vld [vmem:[%s3076_s3 + $0x78] sm:$0xff]  }
  0xe2   :  { %v249_v30 = vpop.f32.mrf.mxu0 }
  0xe3   :  { %v250_v31 = vadd.f32 %v2751_v26, %v249_v30 }
  0xe4   :  { %v2267_v32 = vpop.f32.mrf.mxu0 }
  0xe5   :  { %v349_v34 = vmax.f32 %v250_v31, 0.0  ;;  %v2554_v32 = vld [vmem:[%s3076_s3 + $0x70] sm:$0xff]  }
  0xe6   :  { %v254_v35 = vpop.f32.mrf.mxu0 }
  0xe7   :  { %v373_v36 = vpack.c.bf16 %v349_v34, %v348_v33  ;;  %v255_v46 = vadd.f32 %v2751_v26, %v254_v35 }
  0xe8   :  { %v2270_v38 = vpop.f32.mrf.mxu0 }
  0xe9   :  { %v396_v39 = vrot.slane %v373_v36, 4  ;;  %v350_v51 = vmax.f32 %v255_v46, 0.0 }
  0xea   :  { %v257_v40 = vpop.f32.mrf.mxu0 }
  0xeb   :  { %2321 = vmatmul.mubr.msk.bf16.vlgmr.msra.gmra.mxu1 %vm409_vm3, %v396_v39  ;;  %v258_v47 = vadd.f32 %v2751_v26, %v257_v40 }
  0xec   :  { %2325 = vmatpush3.bf16.msra.mxu1 %v2540_v37  ;;  %v2271_v42 = vpop.f32.mrf.mxu0  ;;  %2328 = vmatprep.mubr.msk.bf16.mxu1 %vm2589_vm1, %v2588_v0 }
  0xed   :  { %2326 = vmatprep.subr.bf16.mxu1 %v2588_v0  ;;  %v351_v52 = vmax.f32 %v258_v47, 0.0 }
  0xee   :  { %v262_v43 = vpop.f32.mrf.mxu0 }
  0xef   :  { %v374_v56 = vpack.c.bf16 %v351_v52, %v350_v51  ;;  %v263_v1 = vadd.f32 %v2751_v26, %v262_v43 }
  0xf0   :  { %2327 = vmatpush3.bf16.msra.mxu1 %v2541_v41  ;;  %v2274_v45 = vpop.f32.mrf.mxu0 }
  0xf1   :  { %2332 = vmatprep.subr.bf16.mxu1 %v2588_v0  ;;  %v575_v63 = vrot.slane %v374_v56, 4  ;;  %v352_v6 = vmax.f32 %v263_v1, 0.0  ;;  %v2575_v1 = vld [vmem:[%s3076_s3 + $0x148] sm:$0xff]  }
  0xf2   :  { %v265_v48 = vpop.f32.mrf.mxu0 }
  0xf3   :  { %2329 = vmatmul.mubr.msk.bf16.vlgmr.msra.gmra.mxu1 %vm409_vm3, %v373_v36  ;;  %v266_v2 = vadd.f32 %v2751_v26, %v265_v48  ;;  %v2555_v36 = vld [vmem:[%s3076_s3 + $0x88] sm:$0xff]  }
  0xf4   :  { %2333 = vmatpush3.bf16.msra.mxu1 %v2542_v44  ;;  %2336 = vmatprep.mubr.msk.bf16.mxu1 %vm2589_vm1, %v2588_v0  ;;  %v2275_v50 = vpop.f32.mrf.mxu0  ;;  %v2556_v44 = vld [vmem:[%s3076_s3 + $0x80] sm:$0xff]  }
  0xf5   :  { %2334 = vmatprep.subr.bf16.mxu1 %v2588_v0  ;;  %v353_v7 = vmax.f32 %v266_v2, 0.0  ;;  %v2571_v50 = vld [vmem:[%s3076_s3 + $0x128] sm:$0xff]  }
  0xf6   :  { %v270_v53 = vpop.f32.mrf.mxu0 }
  0xf7   :  { %v375_v11 = vpack.c.bf16 %v353_v7, %v352_v6  ;;  %v271_v19 = vadd.f32 %v2751_v26, %v270_v53  ;;  %v2557_v53 = vld [vmem:[%s3076_s3 + $0x98] sm:$0xff]  }
  0xf8   :  { %2335 = vmatpush3.bf16.msra.mxu1 %v2543_v49  ;;  %v2278_v55 = vpop.f32.mrf.mxu0 }
  0xf9   :  { %2340 = vmatprep.subr.bf16.mxu1 %v2588_v0  ;;  %v699_v18 = vrot.slane %v375_v11, 4  ;;  %v354_v24 = vmax.f32 %v271_v19, 0.0 }
  0xfa   :  { %v273_v57 = vpop.f32.mrf.mxu0 }
  0xfb   :  { %2337 = vmatmul.mubr.msk.bf16.vlgmr.msra.gmra.mxu1 %vm409_vm3, %v374_v56  ;;  %v274_v20 = vadd.f32 %v2751_v26, %v273_v57  ;;  %v2573_v57 = vld [vmem:[%s3076_s3 + $0x120] sm:$0xff]  }
  0xfc   :  { %2341 = vmatpush3.bf16.msra.mxu1 %v2544_v54  ;;  %2344 = vmatprep.mubr.msk.bf16.mxu1 %vm2589_vm1, %v2588_v0  ;;  %v2279_v59 = vpop.f32.mrf.mxu0 }
  0xfd   :  { %2342 = vmatprep.subr.bf16.mxu1 %v2588_v0  ;;  %v355_v25 = vmax.f32 %v274_v20, 0.0  ;;  %v2579_v20 = vld [vmem:[%s3076_s3 + $0x168] sm:$0xff]  }
  0xfe   :  { %v2789_v60 = vpop.f32.mrf.mxu0 }
  0xff   :  { %v376_v30 = vpack.c.bf16 %v355_v25, %v354_v24  ;;  %v279_v39 = vadd.f32 %v2751_v26, %v2789_v60  ;;  %v2558_v60 = vld [vmem:[%s3076_s3 + $0x90] sm:$0xff]   ;;  %v2562_v24 = vld [vmem:[%s3076_s3 + $0xb8] sm:$0xff]  }
 0x100   :  { %2343 = vmatpush3.bf16.msra.mxu1 %v2546_v58  ;;  %v2282_v62 = vpop.f32.mrf.mxu0 }
 0x101   :  { %2348 = vmatprep.subr.bf16.mxu1 %v2588_v0  ;;  %v823_v38 = vrot.slane %v376_v30, 4  ;;  %v356_v46 = vmax.f32 %v279_v39, 0.0 }
 0x102   :  { %v281_v3 = vpop.f32.mrf.mxu0 }
 0x103   :  { %2345 = vmatmul.mubr.msk.bf16.vlgmr.msra.gmra.mxu1 %vm409_vm3, %v575_v63  ;;  %v282_v40 = vadd.f32 %v2751_v26, %v281_v3 }
 0x104   :  { %2349 = vmatpush3.bf16.msra.mxu1 %v2547_v61  ;;  %2352 = vmatprep.mubr.msk.bf16.mxu1 %vm2589_vm1, %v2588_v0  ;;  %v2283_v5 = vpop.f32.mrf.mxu0 }
 0x105   :  { %2350 = vmatprep.subr.bf16.mxu1 %v2588_v0  ;;  %v357_v47 = vmax.f32 %v282_v40, 0.0 }
 0x106   :  { %v2804_v8 = vpop.f32.mrf.mxu0 }
 0x107   :  { %v377_v55 = vpack.c.bf16 %v357_v47, %v356_v46  ;;  %v287_v7 = vadd.f32 %v2751_v26, %v2804_v8 }
 0x108   :  { %2351 = vmatpush3.bf16.msra.mxu1 %v2548_v4  ;;  %v2286_v10 = vpop.f32.mrf.mxu0  ;;  %v2560_v4 = vld [vmem:[%s3076_s3 + $0xa8] sm:$0xff]  }
 0x109   :  { %2356 = vmatprep.subr.bf16.mxu1 %v2588_v0  ;;  %v947_v6 = vrot.slane %v377_v55, 4 }
 0x10a   :  { %v2810_v12 = vpop.f32.mrf.mxu0 }
 0x10b   :  { %2353 = vmatmul.mubr.msk.bf16.vlgmr.msra.gmra.mxu1 %vm409_vm3, %v375_v11  ;;  %v2577_v11 = vld [vmem:[%s3076_s3 + $0x140] sm:$0xff]  }
 0x10c   :  { %2357 = vmatpush3.bf16.msra.mxu1 %v2549_v9  ;;  %2360 = vmatprep.mubr.msk.bf16.mxu1 %vm2589_vm1, %v2588_v0  ;;  %v2287_v14 = vpop.f32.mrf.mxu0  ;;  %v290_v9 = vadd.f32 %v2751_v26, %v2810_v12  ;;  %v2561_v12 = vld [vmem:[%s3076_s3 + $0xa0] sm:$0xff]  }
 0x10d   :  { %2358 = vmatprep.subr.bf16.mxu1 %v2588_v0 }
 0x10e   :  { %v2819_v15 = vpop.f32.mrf.mxu0 }
 0x110   :  { %2359 = vmatpush3.bf16.msra.mxu1 %v2550_v13  ;;  %v2290_v17 = vpop.f32.mrf.mxu0 }
 0x111   :  { %2364 = vmatprep.subr.bf16.mxu1 %v2588_v0  ;;  %v359_v17 = vmax.f32 %v290_v9, 0.0  ;;  %v2583_v9 = vld [vmem:[%s3076_s3 + $0x150] sm:$0xff]  }
 0x112   :  { %v2827_v21 = vpop.f32.mrf.mxu0 }
 0x113   :  { %2361 = vmatmul.mubr.msk.bf16.vlgmr.msra.gmra.mxu1 %vm409_vm3, %v699_v18 }
 0x114   :  { %2365 = vmatpush3.bf16.msra.mxu1 %v2551_v16  ;;  %2368 = vmatprep.mubr.msk.bf16.mxu1 %vm2589_vm1, %v2588_v0  ;;  %v2291_v23 = vpop.f32.mrf.mxu0  ;;  %v358_v16 = vmax.f32 %v287_v7, 0.0  ;;  %v2582_v7 = vld [vmem:[%s3076_s3 + $0x158] sm:$0xff]  }
 0x115   :  { %2366 = vmatprep.subr.bf16.mxu1 %v2588_v0 }
 0x116   :  { %v2836_v27 = vpop.f32.mrf.mxu0 }
 0x118   :  { %2367 = vmatpush3.bf16.msra.mxu1 %v2552_v22  ;;  %v2294_v29 = vpop.f32.mrf.mxu0 }
 0x119   :  { %2372 = vmatprep.subr.bf16.mxu1 %v2588_v0 }
 0x11a   :  { %v2842_v31 = vpop.f32.mrf.mxu0 }
 0x11b   :  { %2369 = vmatmul.mubr.msk.bf16.vlgmr.msra.gmra.mxu1 %vm409_vm3, %v376_v30  ;;  %v2581_v30 = vld [vmem:[%s3076_s3 + $0x160] sm:$0xff]  }
 0x11c   :  { %2373 = vmatpush3.bf16.msra.mxu1 %v2553_v28  ;;  %2376 = vmatprep.mubr.msk.bf16.mxu1 %vm2589_vm1, %v2588_v0  ;;  %v2295_v33 = vpop.f32.mrf.mxu0  ;;  %v378_v28 = vpack.c.bf16 %v359_v17, %v358_v16 }
 0x11d   :  { %2374 = vmatprep.subr.bf16.mxu1 %v2588_v0 }
 0x11e   :  { %v310_v34 = vpop.f32.mrf.mxu0 }
 0x11f   :  { %v311_v35 = vadd.f32 %v2751_v26, %v310_v34  ;;  %v2563_v34 = vld [vmem:[%s3076_s3 + $0xb0] sm:$0xff]  }
 0x120   :  { %2375 = vmatpush3.bf16.msra.mxu1 %v2554_v32  ;;  %v2298_v37 = vpop.f32.mrf.mxu0 }
 0x121   :  { %2380 = vmatprep.subr.bf16.mxu1 %v2588_v0  ;;  %v364_v42 = vmax.f32 %v311_v35, 0.0 }
 0x122   :  { %v313_v41 = vpop.f32.mrf.mxu0 }
 0x123   :  { %2377 = vmatmul.mubr.msk.bf16.vlgmr.msra.gmra.mxu1 %vm409_vm3, %v823_v38  ;;  %v314_v43 = vadd.f32 %v2751_v26, %v313_v41  ;;  %v2584_v38 = vld [vmem:[%s3076_s3 + $0x188] sm:$0xff]  }
 0x124   :  { %2381 = vmatpush3.bf16.msra.mxu1 %v2555_v36  ;;  %2384 = vmatprep.mubr.msk.bf16.mxu1 %vm2589_vm1, %v2588_v0  ;;  %v2299_v45 = vpop.f32.mrf.mxu0  ;;  %v2564_v41 = vld [vmem:[%s3076_s3 + $0xc8] sm:$0xff]  }
 0x125   :  { %2382 = vmatprep.subr.bf16.mxu1 %v2588_v0  ;;  %v365_v48 = vmax.f32 %v314_v43, 0.0  ;;  %v1071_v43 = vrot.slane %v378_v28, 4  ;;  %v298_v45 = vadd.f32 %v2751_v26, %v2827_v21 }
 0x126   :  { %v318_v49 = vpop.f32.mrf.mxu0 }
 0x127   :  { %v2870_v51 = vpack.c.bf16 %v365_v48, %v364_v42  ;;  %v319_v52 = vadd.f32 %v2751_v26, %v318_v49  ;;  %v2586_v48 = vld [vmem:[%s3076_s3 + $0x180] sm:$0xff]  }
 0x128   :  { %2383 = vmatpush3.bf16.msra.mxu1 %v2556_v44  ;;  %v2302_v54 = vpop.f32.mrf.mxu0  ;;  %v295_v44 = vadd.f32 %v2751_v26, %v2819_v15  ;;  %v2565_v15 = vld [vmem:[%s3076_s3 + $0xc0] sm:$0xff]  }
 0x129   :  { %2388 = vmatprep.subr.bf16.mxu1 %v2588_v0  ;;  %2449 = vmatmul.mubr.msk.bf16.vlgmr.msra.gmra.mxu0 %vm409_vm3, %v2870_v51  ;;  %v366_v58 = vmax.f32 %v319_v52, 0.0 }
 0x12a   :  { %v321_v56 = vpop.f32.mrf.mxu0  ;;  %2461 = vmatpush3.bf16.msra.mxu0 %v2571_v50  ;;  %2464 = vmatprep.mubr.msk.bf16.mxu0 %vm2589_vm1, %v2588_v0  ;;  %v360_v49 = vmax.f32 %v295_v44, 0.0  ;;  %v361_v50 = vmax.f32 %v298_v45, 0.0 }
 0x12b   :  { %2385 = vmatmul.mubr.msk.bf16.vlgmr.msra.gmra.mxu1 %vm409_vm3, %v377_v55  ;;  %v322_v59 = vadd.f32 %v2751_v26, %v321_v56  ;;  %2462 = vmatprep.subr.bf16.mxu0 %v2588_v0  ;;  %v2567_v55 = vld [vmem:[%s3076_s3 + $0xd0] sm:$0xff]   ;;  %v2568_v56 = vld [vmem:[%s3076_s3 + $0xe8] sm:$0xff]  }
 0x12c   :  { %2389 = vmatpush3.bf16.msra.mxu1 %v2557_v53  ;;  %2392 = vmatprep.mubr.msk.bf16.mxu1 %vm2589_vm1, %v2588_v0  ;;  %v2303_v61 = vpop.f32.mrf.mxu0  ;;  %v2566_v53 = vld [vmem:[%s3076_s3 + $0xd8] sm:$0xff]   ;;  %v379_v54 = vpack.c.bf16 %v361_v50, %v360_v49 }
 0x12d   :  { %2390 = vmatprep.subr.bf16.mxu1 %v2588_v0  ;;  %v367_v62 = vmax.f32 %v322_v59, 0.0  ;;  %v306_v59 = vadd.f32 %v2751_v26, %v2842_v31  ;;  %v2572_v31 = vld [vmem:[%s3076_s3 + $0xf0] sm:$0xff]  }
 0x12e   :  { %v326_v63 = vpop.f32.mrf.mxu0  ;;  %2463 = vmatpush3.bf16.msra.mxu0 %v2573_v57  ;;  %v1195_v57 = vrot.slane %v379_v54, 4 }
 0x12f   :  { %v2896_v2 = vpack.c.bf16 %v367_v62, %v366_v58  ;;  %v327_v3 = vadd.f32 %v2751_v26, %v326_v63  ;;  %2476 = vmatprep.subr.bf16.mxu0 %v2588_v0  ;;  %v303_v58 = vadd.f32 %v2751_v26, %v2836_v27  ;;  %v363_v62 = vmax.f32 %v306_v59, 0.0  ;;  %v2574_v63 = vld [vmem:[%s3076_s3 + $0x118] sm:$0xff]  }
 0x130   :  { %2391 = vmatpush3.bf16.msra.mxu1 %v2558_v60  ;;  %v2306_v5 = vpop.f32.mrf.mxu0  ;;  %v2569_v60 = vld [vmem:[%s3076_s3 + $0xe0] sm:$0xff]  }
 0x131   :  { %2396 = vmatprep.subr.bf16.mxu1 %v2588_v0  ;;  %2465 = vmatmul.mubr.msk.bf16.vlgmr.msra.gmra.mxu0 %vm409_vm3, %v2896_v2  ;;  %v368_v8 = vmax.f32 %v327_v3, 0.0  ;;  %v362_v61 = vmax.f32 %v303_v58, 0.0  ;;  %v2576_v3 = vld [vmem:[%s3076_s3 + $0x110] sm:$0xff]   ;;  %v1443_v5 = vrot.slane %v2870_v51, 4  ;;  %v1567_v51 = vrot.slane %v2896_v2, 4 }
 0x132   :  { %v329_v10 = vpop.f32.mrf.mxu0  ;;  %2477 = vmatpush3.bf16.msra.mxu0 %v2575_v1  ;;  %2480 = vmatprep.mubr.msk.bf16.mxu0 %vm2589_vm1, %v2588_v0 }
 0x133   :  { %2393 = vmatmul.mubr.msk.bf16.vlgmr.msra.gmra.mxu1 %vm409_vm3, %v947_v6  ;;  %v330_v13 = vadd.f32 %v2751_v26, %v329_v10  ;;  %2478 = vmatprep.subr.bf16.mxu0 %v2588_v0  ;;  %v380_v27 = vpack.c.bf16 %v363_v62, %v362_v61  ;;  %v2580_v6 = vld [vmem:[%s3076_s3 + $0x130] sm:$0xff]   ;;  %v2585_v10 = vld [vmem:[%s3076_s3 + $0x178] sm:$0xff]  }
 0x134   :  { %2397 = vmatpush3.bf16.msra.mxu1 %v2560_v4  ;;  %2400 = vmatprep.mubr.msk.bf16.mxu1 %vm2589_vm1, %v2588_v0  ;;  %v2307_v14 = vpop.f32.mrf.mxu0  ;;  %v2578_v4 = vld [vmem:[%s3076_s3 + $0x138] sm:$0xff]  }
 0x135   :  { %2398 = vmatprep.subr.bf16.mxu1 %v2588_v0  ;;  %v369_v18 = vmax.f32 %v330_v13, 0.0  ;;  %v1319_v1 = vrot.slane %v380_v27, 4 }
 0x136   :  { %v334_v19 = vpop.f32.mrf.mxu0  ;;  %2479 = vmatpush3.bf16.msra.mxu0 %v2577_v11  ;;  %v2587_v11 = vld [vmem:[%s3076_s3 + $0x170] sm:$0xff]  }
 0x137   :  { %v2927_v22 = vpack.c.bf16 %v369_v18, %v368_v8  ;;  %v335_v23 = vadd.f32 %v2751_v26, %v334_v19  ;;  %2492 = vmatprep.subr.bf16.mxu0 %v2588_v0 }
 0x138   :  { %2399 = vmatpush3.bf16.msra.mxu1 %v2561_v12  ;;  %v2310_v25 = vpop.f32.mrf.mxu0 }
 0x139   :  { %2404 = vmatprep.subr.bf16.mxu1 %v2588_v0  ;;  %2481 = vmatmul.mubr.msk.bf16.vlgmr.msra.gmra.mxu0 %vm409_vm3, %v2927_v22  ;;  %v370_v32 = vmax.f32 %v335_v23, 0.0  ;;  %v1691_v2 = vrot.slane %v2927_v22, 4 }
 0x13a   :  { %v337_v29 = vpop.f32.mrf.mxu0  ;;  %2493 = vmatpush3.bf16.msra.mxu0 %v2579_v20  ;;  %2496 = vmatprep.mubr.msk.bf16.mxu0 %vm2589_vm1, %v2588_v0 }
 0x13b   :  { %2401 = vmatmul.mubr.msk.bf16.vlgmr.msra.gmra.mxu1 %vm409_vm3, %v378_v28  ;;  %v338_v33 = vadd.f32 %v2751_v26, %v337_v29  ;;  %2494 = vmatprep.subr.bf16.mxu0 %v2588_v0 }
 0x13c   :  { %2405 = vmatpush3.bf16.msra.mxu1 %v2562_v24  ;;  %2408 = vmatprep.mubr.msk.bf16.mxu1 %vm2589_vm1, %v2588_v0  ;;  %v2311_v35 = vpop.f32.mrf.mxu0 }
 0x13d   :  { %2406 = vmatprep.subr.bf16.mxu1 %v2588_v0  ;;  %v371_v36 = vmax.f32 %v338_v33, 0.0 }
 0x13e   :  { %2495 = vmatpush3.bf16.msra.mxu0 %v2581_v30  ;;  %v342_v37 = vpop.f32.mrf.mxu0 }
 0x13f   :  { %v2954_v39 = vpack.c.bf16 %v371_v36, %v370_v32  ;;  %2508 = vmatprep.subr.bf16.mxu0 %v2588_v0  ;;  %v343_v40 = vadd.f32 %v2751_v26, %v342_v37  ;;  %v2570_v26 = vld [vmem:[%s3076_s3 + $0xf8] sm:$0xff]  }
 0x140   :  { %2407 = vmatpush3.bf16.msra.mxu1 %v2563_v34  ;;  %v2314_v42 = vpop.f32.mrf.mxu0 }
 0x141   :  { %2412 = vmatprep.subr.bf16.mxu1 %v2588_v0  ;;  %2497 = vmatmul.mubr.msk.bf16.vlgmr.msra.gmra.mxu0 %vm409_vm3, %v2954_v39  ;;  %v372_v46 = vmax.f32 %v343_v40, 0.0  ;;  %v1815_v8 = vrot.slane %v2954_v39, 4 }
 0x142   :  { %2509 = vmatpush3.bf16.msra.mxu0 %v2584_v38  ;;  %v345_v47 = vpop.f32.mrf.mxu0  ;;  %2512 = vmatprep.mubr.msk.bf16.mxu0 %vm2589_vm1, %v2588_v0 }
 0x143   :  { %2409 = vmatmul.mubr.msk.bf16.vlgmr.msra.gmra.mxu1 %vm409_vm3, %v1071_v43  ;;  %2510 = vmatprep.subr.bf16.mxu0 %v2588_v0  ;;  %v385_v52 = vpack.c.bf16 %v372_v46, %v372_v46 }
 0x144   :  { %2413 = vmatpush3.bf16.msra.mxu1 %v2564_v41  ;;  %2416 = vmatprep.mubr.msk.bf16.mxu1 %vm2589_vm1, %v2588_v0  ;;  %v2315_v21 = vpop.f32.mrf.mxu0 }
 0x145   :  { %2414 = vmatprep.subr.bf16.mxu1 %v2588_v0 }
 0x146   :  { %2511 = vmatpush3.bf16.msra.mxu0 %v2586_v48 }
 0x148   :  { %2415 = vmatpush3.bf16.msra.mxu1 %v2565_v15 }
 0x149   :  { %2420 = vmatprep.subr.bf16.mxu1 %v2588_v0  ;;  %2513 = vmatmul.mubr.msk.bf16.vlgmr.msra.gmra.mxu0 %vm409_vm3, %v385_v52 }
 0x14b   :  { %2417 = vmatmul.mubr.msk.bf16.vlgmr.msra.gmra.mxu1 %vm409_vm3, %v379_v54 }
 0x14c   :  { %2421 = vmatpush3.bf16.msra.mxu1 %v2566_v53  ;;  %2424 = vmatprep.mubr.msk.bf16.mxu1 %vm2589_vm1, %v2588_v0 }
 0x14d   :  { %2422 = vmatprep.subr.bf16.mxu1 %v2588_v0 }
 0x150   :  { %2423 = vmatpush3.bf16.msra.mxu1 %v2567_v55 }
 0x151   :  { %2428 = vmatprep.subr.bf16.mxu1 %v2588_v0 }
 0x153   :  { %2425 = vmatmul.mubr.msk.bf16.vlgmr.msra.gmra.mxu1 %vm409_vm3, %v1195_v57 }
 0x154   :  { %2429 = vmatpush3.bf16.msra.mxu1 %v2568_v56  ;;  %2432 = vmatprep.mubr.msk.bf16.mxu1 %vm2589_vm1, %v2588_v0 }
 0x155   :  { %2430 = vmatprep.subr.bf16.mxu1 %v2588_v0 }
 0x158   :  { %2431 = vmatpush3.bf16.msra.mxu1 %v2569_v60 }
 0x159   :  { %2436 = vmatprep.subr.bf16.mxu1 %v2588_v0 }
 0x15b   :  { %2433 = vmatmul.mubr.msk.bf16.vlgmr.msra.gmra.mxu1 %vm409_vm3, %v380_v27 }
 0x15c   :  { %2437 = vmatpush3.bf16.msra.mxu1 %v2570_v26  ;;  %2440 = vmatprep.mubr.msk.bf16.mxu1 %vm2589_vm1, %v2588_v0 }
 0x15d   :  { %2438 = vmatprep.subr.bf16.mxu1 %v2588_v0 }
 0x160   :  { %2439 = vmatpush3.bf16.msra.mxu1 %v2572_v31 }
 0x161   :  { %2452 = vmatprep.subr.bf16.mxu1 %v2588_v0 }
 0x163   :  { %2441 = vmatmul.mubr.msk.bf16.vlgmr.msra.gmra.mxu1 %vm409_vm3, %v1319_v1 }
 0x164   :  { %2453 = vmatpush3.bf16.msra.mxu1 %v2574_v63  ;;  %2456 = vmatprep.mubr.msk.bf16.mxu1 %vm2589_vm1, %v2588_v0 }
 0x165   :  { %2454 = vmatprep.subr.bf16.mxu1 %v2588_v0 }
 0x168   :  { %2455 = vmatpush3.bf16.msra.mxu1 %v2576_v3 }
 0x169   :  { %2468 = vmatprep.subr.bf16.mxu1 %v2588_v0 }
 0x16b   :  { %2457 = vmatmul.mubr.msk.bf16.vlgmr.msra.gmra.mxu1 %vm409_vm3, %v1443_v5 }
 0x16c   :  { %2469 = vmatpush3.bf16.msra.mxu1 %v2578_v4  ;;  %2472 = vmatprep.mubr.msk.bf16.mxu1 %vm2589_vm1, %v2588_v0 }
 0x16d   :  { %2470 = vmatprep.subr.bf16.mxu1 %v2588_v0 }
 0x170   :  { %2471 = vmatpush3.bf16.msra.mxu1 %v2580_v6 }
 0x171   :  { %2484 = vmatprep.subr.bf16.mxu1 %v2588_v0 }
 0x173   :  { %2473 = vmatmul.mubr.msk.bf16.vlgmr.msra.gmra.mxu1 %vm409_vm3, %v1567_v51 }
 0x174   :  { %2485 = vmatpush3.bf16.msra.mxu1 %v2582_v7  ;;  %2488 = vmatprep.mubr.msk.bf16.mxu1 %vm2589_vm1, %v2588_v0 }
 0x175   :  { %2486 = vmatprep.subr.bf16.mxu1 %v2588_v0 }
 0x178   :  { %2487 = vmatpush3.bf16.msra.mxu1 %v2583_v9 }
 0x179   :  { %2500 = vmatprep.subr.bf16.mxu1 %v2588_v0 }
 0x17b   :  { %2489 = vmatmul.mubr.msk.bf16.vlgmr.msra.gmra.mxu1 %vm409_vm3, %v1691_v2 }
 0x17c   :  { %2501 = vmatpush3.bf16.msra.mxu1 %v2585_v10  ;;  %2504 = vmatprep.mubr.msk.bf16.mxu1 %vm2589_vm1, %v2588_v0 }
 0x17d   :  { %2502 = vmatprep.subr.bf16.mxu1 %v2588_v0 }
 0x180   :  { %2503 = vmatpush3.bf16.msra.mxu1 %v2587_v11 }
 0x183   :  { %2505 = vmatmul.mubr.msk.bf16.vlgmr.msra.gmra.mxu1 %vm409_vm3, %v1815_v8 }
 0x1ab   :  { %v447_v13 = vpop.f32.mrf.mxu1 }
 0x1ad   :  { %v2322_v12 = vpop.f32.mrf.mxu1 }
 0x1af   :  { %v450_v14 = vpop.f32.mrf.mxu1 }
 0x1b1   :  { %v2323_v16 = vpop.f32.mrf.mxu1 }
 0x1b3   :  { %v502_v17 = vpop.f32.mrf.mxu1 }
 0x1b4   :  { %v503_v18 = vadd.f32 %v502_v17, %v447_v13 }
 0x1b5   :  { %v2330_v19 = vpop.f32.mrf.mxu1 }
 0x1b7   :  { %v505_v20 = vpop.f32.mrf.mxu1 }
 0x1b9   :  { %v2331_v22 = vpop.f32.mrf.mxu1 }
 0x1bb   :  { %v562_v23 = vpop.f32.mrf.mxu1 }
 0x1bc   :  { %v568_v24 = vadd.f32 %v562_v23, %v503_v18 }
 0x1bd   :  { %v2338_v25 = vpop.f32.mrf.mxu1 }
 0x1bf   :  { %v565_v28 = vpop.f32.mrf.mxu1 }
 0x1c1   :  { %v2339_v29 = vpop.f32.mrf.mxu1 }
 0x1c3   :  { %v625_v0 = vpop.f32.mrf.mxu1 }
 0x1c4   :  { %v631_v30 = vadd.f32 %v625_v0, %v568_v24 }
 0x1c5   :  { %v2346_v32 = vpop.f32.mrf.mxu1 }
 0x1c7   :  { %v628_v33 = vpop.f32.mrf.mxu1 }
 0x1c9   :  { %v2347_v34 = vpop.f32.mrf.mxu1 }
 0x1cb   :  { %v686_v35 = vpop.f32.mrf.mxu1 }
 0x1cc   :  { %v692_v36 = vadd.f32 %v686_v35, %v631_v30 }
 0x1cd   :  { %v2354_v37 = vpop.f32.mrf.mxu1 }
 0x1cf   :  { %v689_v38 = vpop.f32.mrf.mxu1 }
 0x1d1   :  { %v2355_v39 = vpop.f32.mrf.mxu1 }
 0x1d3   :  { %v749_v40 = vpop.f32.mrf.mxu1 }
 0x1d4   :  { %v755_v41 = vadd.f32 %v749_v40, %v692_v36 }
 0x1d5   :  { %v2362_v42 = vpop.f32.mrf.mxu1 }
 0x1d7   :  { %v752_v43 = vpop.f32.mrf.mxu1 }
 0x1d9   :  { %v2363_v44 = vpop.f32.mrf.mxu1 }
 0x1db   :  { %v810_v45 = vpop.f32.mrf.mxu1 }
 0x1dc   :  { %v816_v46 = vadd.f32 %v810_v45, %v755_v41 }
 0x1dd   :  { %v2370_v47 = vpop.f32.mrf.mxu1 }
 0x1df   :  { %v813_v48 = vpop.f32.mrf.mxu1 }
 0x1e1   :  { %v2371_v15 = vpop.f32.mrf.mxu1 }
 0x1e3   :  { %v873_v21 = vpop.f32.mrf.mxu1 }
 0x1e4   :  { %v879_v49 = vadd.f32 %v873_v21, %v816_v46 }
 0x1e5   :  { %v2378_v50 = vpop.f32.mrf.mxu1 }
 0x1e7   :  { %v876_v52 = vpop.f32.mrf.mxu1 }
 0x1e9   :  { %v2379_v53 = vpop.f32.mrf.mxu1  ;;  %v1430_v54 = vpop.f32.mrf.mxu0 }
 0x1eb   :  { %v934_v55 = vpop.f32.mrf.mxu1  ;;  %v2450_v56 = vpop.f32.mrf.mxu0 }
 0x1ec   :  { %v940_v33 = vadd.f32 %v934_v55, %v879_v49 }
 0x1ed   :  { %v2386_v57 = vpop.f32.mrf.mxu1  ;;  %v1433_v58 = vpop.f32.mrf.mxu0 }
 0x1ef   :  { %v937_v59 = vpop.f32.mrf.mxu1  ;;  %v2451_v60 = vpop.f32.mrf.mxu0 }
 0x1f1   :  { %v2387_v61 = vpop.f32.mrf.mxu1  ;;  %v1554_v62 = vpop.f32.mrf.mxu0 }
 0x1f3   :  { %v997_v26 = vpop.f32.mrf.mxu1  ;;  %v2466_v27 = vpop.f32.mrf.mxu0 }
 0x1f4   :  { %v1003_v35 = vadd.f32 %v997_v26, %v940_v33 }
 0x1f5   :  { %v2394_v31 = vpop.f32.mrf.mxu1  ;;  %v1557_v63 = vpop.f32.mrf.mxu0 }
 0x1f7   :  { %v1000_v1 = vpop.f32.mrf.mxu1  ;;  %v2467_v3 = vpop.f32.mrf.mxu0 }
 0x1f9   :  { %v2395_v4 = vpop.f32.mrf.mxu1  ;;  %v1678_v5 = vpop.f32.mrf.mxu0 }
 0x1fb   :  { %v1058_v6 = vpop.f32.mrf.mxu1  ;;  %v2482_v7 = vpop.f32.mrf.mxu0 }
 0x1fc   :  { %v1064_v37 = vadd.f32 %v1058_v6, %v1003_v35 }
 0x1fd   :  { %v2402_v51 = vpop.f32.mrf.mxu1  ;;  %v1681_v9 = vpop.f32.mrf.mxu0 }
 0x1ff   :  { %v1061_v10 = vpop.f32.mrf.mxu1  ;;  %v2483_v2 = vpop.f32.mrf.mxu0 }
 0x201   :  { %v2403_v11 = vpop.f32.mrf.mxu1  ;;  %v1802_v8 = vpop.f32.mrf.mxu0 }
 0x203   :  { %v1121_v13 = vpop.f32.mrf.mxu1  ;;  %v2498_v12 = vpop.f32.mrf.mxu0 }
 0x204   :  { %v1127_v39 = vadd.f32 %v1121_v13, %v1064_v37 }
 0x205   :  { %v2410_v14 = vpop.f32.mrf.mxu1  ;;  %v1805_v16 = vpop.f32.mrf.mxu0 }
 0x207   :  { %v1124_v17 = vpop.f32.mrf.mxu1  ;;  %v2499_v18 = vpop.f32.mrf.mxu0 }
 0x209   :  { %v2411_v19 = vpop.f32.mrf.mxu1  ;;  %v1926_v20 = vpop.f32.mrf.mxu0 }
 0x20b   :  { %v1182_v22 = vpop.f32.mrf.mxu1  ;;  %v2514_v23 = vpop.f32.mrf.mxu0 }
 0x20c   :  { %v1188_v41 = vadd.f32 %v1182_v22, %v1127_v39 }
 0x20d   :  { %v2418_v24 = vpop.f32.mrf.mxu1  ;;  %v1929_v25 = vpop.f32.mrf.mxu0 }
 0x20f   :  { %v1185_v28 = vpop.f32.mrf.mxu1  ;;  %v2515_v29 = vpop.f32.mrf.mxu0 }
 0x211   :  { %v2419_v0 = vpop.f32.mrf.mxu1 }
 0x213   :  { %v1245_v30 = vpop.f32.mrf.mxu1 }
 0x214   :  { %v1251_v43 = vadd.f32 %v1245_v30, %v1188_v41 }
 0x215   :  { %v2426_v32 = vpop.f32.mrf.mxu1 }
 0x217   :  { %v1248_v34 = vpop.f32.mrf.mxu1 }
 0x219   :  { %v2427_v36 = vpop.f32.mrf.mxu1 }
 0x21b   :  { %v1306_v38 = vpop.f32.mrf.mxu1 }
 0x21c   :  { %v1312_v45 = vadd.f32 %v1306_v38, %v1251_v43 }
 0x21d   :  { %v2434_v40 = vpop.f32.mrf.mxu1 }
 0x21f   :  { %v1309_v42 = vpop.f32.mrf.mxu1 }
 0x221   :  { %v2435_v44 = vpop.f32.mrf.mxu1 }
 0x223   :  { %v1369_v46 = vpop.f32.mrf.mxu1 }
 0x224   :  { %v1375_v47 = vadd.f32 %v1369_v46, %v1312_v45 }
 0x225   :  { %v2442_v48 = vpop.f32.mrf.mxu1 }
 0x226   :  { %v1436_v15 = vadd.f32 %v1430_v54, %v1375_v47 }
 0x227   :  { %v1372_v21 = vpop.f32.mrf.mxu1 }
 0x229   :  { %v2443_v50 = vpop.f32.mrf.mxu1 }
 0x22b   :  { %v1493_v52 = vpop.f32.mrf.mxu1 }
 0x22c   :  { %v1499_v49 = vadd.f32 %v1493_v52, %v1436_v15 }
 0x22d   :  { %v2458_v53 = vpop.f32.mrf.mxu1 }
 0x22e   :  { %v1560_v55 = vadd.f32 %v1554_v62, %v1499_v49  ;;  %v2154_v62 = vld [vmem:[%s3078_s4] ss:$0 sm:$0xff] }
 0x22f   :  { %v1496_v56 = vpop.f32.mrf.mxu1 }
 0x231   :  { %v2459_v57 = vpop.f32.mrf.mxu1 }
 0x233   :  { %v1617_v58 = vpop.f32.mrf.mxu1 }
 0x234   :  { %v1623_v59 = vadd.f32 %v1617_v58, %v1560_v55 }
 0x235   :  { %v2474_v60 = vpop.f32.mrf.mxu1 }
 0x236   :  { %v1684_v61 = vadd.f32 %v1678_v5, %v1623_v59 }
 0x237   :  { %v1620_v26 = vpop.f32.mrf.mxu1 }
 0x239   :  { %v2475_v27 = vpop.f32.mrf.mxu1 }
 0x23b   :  { %v1741_v31 = vpop.f32.mrf.mxu1 }
 0x23c   :  { %v1747_v63 = vadd.f32 %v1741_v31, %v1684_v61 }
 0x23d   :  { %v2490_v1 = vpop.f32.mrf.mxu1 }
 0x23e   :  { %v1808_v3 = vadd.f32 %v1802_v8, %v1747_v63 }
 0x23f   :  { %v1744_v4 = vpop.f32.mrf.mxu1 }
 0x241   :  { %v2491_v54 = vpop.f32.mrf.mxu1 }
 0x243   :  { %v1865_v6 = vpop.f32.mrf.mxu1 }
 0x244   :  { %v1871_v7 = vadd.f32 %v1865_v6, %v1808_v3 }
 0x245   :  { %v2506_v51 = vpop.f32.mrf.mxu1 }
 0x246   :  { %v1932_v9 = vadd.f32 %v1926_v20, %v1871_v7 }
 0x247   :  { %v1868_v10 = vpop.f32.mrf.mxu1 }
 0x248   :  { %v1940_v2 = vadd.f32 %v2154_v62, %v1932_v9 }
 0x249   :  { %v2507_v11 = vpop.f32.mrf.mxu1 }
 0x24a   :  { %v1941_v5 = vmax.f32 %v1940_v2, 0.0 }
 0x24c   :  { %v1942_v13 = vpack.c.bf16 %v1941_v5, %v1941_v5 }
 0x24e   :  { %1944 = vst.msk [vmem:[%s3079_s5] sm:$0xf] %vm1943_vm4, %v1942_v13 }

</bundles_post_ra>
